<compile_context>
chip_gen: v7x
topology: tpu7x:2x2x1
jax: 0.10.0
libtpu: 0.0.40
codegen_flags: <defaults>
</compile_context>

<pallas_src>
import jax
import jax.numpy as jnp
from jax.experimental import pallas as pl
from jax.experimental.pallas import tpu as pltpu

IN_FEATURES = 5000


def _cdiv(a, b):
    return -(-a // b)


def _round_up(a, m):
    return _cdiv(a, m) * m


def _choose_batch_tile(B, block_b):
    """Balanced batch tiling with zero wrapper-side copies of x.

    - tiny B: a single full-dim block (legal even when not a multiple of 8)
    - otherwise: >= 2 sublane-aligned (multiple-of-8) tiles, balanced so an
      unlucky B wastes at most 7 rows; >=2 grid steps lets v7x shard across
      both TensorCores.  The last tile may extend past B; those rows are
      garbage-in/garbage-out and are sliced off by the wrapper.
    """
    n = _cdiv(B, block_b)
    if n == 1 and B >= 16:
        n = 2
    tb = _cdiv(B, n)
    if tb < 8:
        return B, 1
    tb = _round_up(tb, 8)
    return tb, _cdiv(B, tb)


def stm_mlp_kernel(x_ref, w1_ref, b1_ref, w2_ref, b2_ref, o_ref):
    # x:  (TB, K) f32   streamed tile
    # w1: (K, H)  bf16  resident
    # b1: (1, H)  f32   resident
    # w2: (1, H)  f32   resident (row form of the (H, 1) classifier weight)
    # b2: (1, 1)  f32   resident
    # o:  (1, 1, TB) f32  lane-dense probabilities
    x = x_ref[...].astype(jnp.bfloat16)          # cast in VMEM, hidden under DMA
    hid = jnp.dot(x, w1_ref[...],
                  preferred_element_type=jnp.float32) + b1_ref[...]

    # Dropout with p = 0 (eval semantics) is the identity.
    # TODO(synk): training-mode dropout (p > 0) needs an in-kernel mask from
    # pltpu.prng_seed(program_id)/pltpu.prng_random_bits with 1/(1-p) scaling.

    # Second Linear as w2_row @ hid^T (rhs-transposed dot, the q@k.T pattern)
    # so the logits come out lane-dense (1, TB) and store as unmasked vst.
    logits = jax.lax.dot_general(
        w2_ref[...], hid,
        dimension_numbers=(((1,), (1,)), ((), ())),
        preferred_element_type=jnp.float32) + b2_ref[...]          # (1, TB)

    # Exact, numerically stable sigmoid (exp of a non-positive argument only).
    z = jnp.exp(-jnp.abs(logits))
    probs = jnp.where(logits >= 0, 1.0 / (1.0 + z), z / (1.0 + z))
    o_ref[...] = probs.reshape(o_ref.shape)


def prepare_params(w1, b1, w2, b2):
    """One-time weight packing (hoisted out of the per-call forward path)."""
    w1_k = w1.astype(jnp.bfloat16)                  # (K, H) bf16, VMEM-resident
    b1_k = b1.reshape(1, -1).astype(jnp.float32)    # (1, H)
    w2_k = w2.reshape(1, -1).astype(jnp.float32)    # (H, 1) column -> (1, H) row
    b2_k = b2.reshape(1, 1).astype(jnp.float32)     # (1, 1)
    return w1_k, b1_k, w2_k, b2_k


def stm_mlp_forward(x, w1_k, b1_k, w2_k, b2_k, *, block_b=512):
    """x: (B, 5000) f32, params from prepare_params.  Returns (B,) f32 probs."""
    B, K = x.shape
    H = w1_k.shape[1]
    TB, n_tiles = _choose_batch_tile(B, block_b)

    # Scoped VMEM: double-buffered f32 x tiles + resident weights + headroom.
    k_lanes = _round_up(K, 128)
    h_lanes = _round_up(H, 128)
    vmem_bytes = (2 * TB * k_lanes * 4          # x tiles, f32, double-buffered
                  + 2 * k_lanes * h_lanes * 2   # w1, bf16
                  + 4 * 1024 * 1024)            # small operands + headroom
    vmem_bytes = int(min(vmem_bytes, 60 * 1024 * 1024))   # < v7x 64 MiB physical

    out = pl.pallas_call(
        stm_mlp_kernel,
        out_shape=jax.ShapeDtypeStruct((n_tiles, 1, TB), jnp.float32),
        grid_spec=pltpu.PrefetchScalarGridSpec(
            num_scalar_prefetch=0,
            grid=(n_tiles,),
            in_specs=[
                pl.BlockSpec((TB, K), lambda i: (i, 0)),   # streamed f32 x (full K)
                pl.BlockSpec((K, H), lambda i: (0, 0)),    # resident bf16 w1
                pl.BlockSpec((1, H), lambda i: (0, 0)),    # resident b1
                pl.BlockSpec((1, H), lambda i: (0, 0)),    # resident w2 row
                pl.BlockSpec((1, 1), lambda i: (0, 0)),    # resident b2
            ],
            out_specs=pl.BlockSpec((1, 1, TB), lambda i: (i, 0, 0)),
        ),
        compiler_params=pltpu.CompilerParams(
            dimension_semantics=("parallel",),   # megacore sharding on v7x
            vmem_limit_bytes=vmem_bytes),
        cost_estimate=pl.CostEstimate(
            flops=2 * B * K * H + 2 * B * H,
            transcendentals=B,
            bytes_accessed=B * K * 4 + K * H * 2 + 2 * H * 4 + 4 + B * 4),
    )(x, w1_k, b1_k, w2_k, b2_k)

    return out.reshape(-1)[:B]   # drop tile-overrun rows; == .squeeze(1)


def init_params(key, mlp_hid):
    """Deterministic synthetic parameters matching nn.Linear shapes."""
    k1, k2, k3, k4 = jax.random.split(key, 4)
    # nn.Linear(5000, H): weight (H, 5000), bias (H,) -> stored transposed (5000, H)
    w1 = jax.random.normal(k1, (IN_FEATURES, mlp_hid), jnp.float32) * 0.02
    b1 = jax.random.normal(k2, (1, mlp_hid), jnp.float32) * 0.02
    # nn.Linear(H, 1): weight (1, H), bias (1,) -> stored transposed (H, 1)
    w2 = jax.random.normal(k3, (mlp_hid, 1), jnp.float32) * 0.02
    b2 = jax.random.normal(k4, (1, 1), jnp.float32) * 0.02
    return w1, b1, w2, b2


if __name__ == "__main__":
    args = {"mlp_hid": 32, "dropout": 0.0}   # p=0 -> dropout is exactly identity
    key = jax.random.PRNGKey(0)
    kx, kp = jax.random.split(key)

    B = 2
    x = jax.random.normal(kx, (B, IN_FEATURES), jnp.float32)
    w1, b1, w2, b2 = init_params(kp, args["mlp_hid"])
    params = prepare_params(w1, b1, w2, b2)   # one-time packing

    out = stm_mlp_forward(x, *params)
    out = jax.block_until_ready(out)

    # Reference in plain f32 JAX.  Kernel uses bf16 x/w1 on the MXU -> widened
    # tolerance; sigmoid itself is exact in the kernel.
    ref = jax.nn.sigmoid((x @ w1 + b1) @ w2 + b2)[:, 0]
    assert out.shape == (B,)
    assert jnp.allclose(out, ref, atol=2e-2, rtol=2e-2), (out, ref)

    print("KERNEL_OK")
</pallas_src>

<mosaic_0001>
module attributes {stable_mosaic.version = 11 : i64} {
  func.func @stm_mlp_kernel(%arg0: i32, %arg1: memref<2x5000xf32, #tpu.memory_space<vmem>>, %arg2: memref<5000x32xbf16, #tpu.memory_space<vmem>>, %arg3: memref<1x32xf32, #tpu.memory_space<vmem>>, %arg4: memref<1x32xf32, #tpu.memory_space<vmem>>, %arg5: memref<1x1xf32, #tpu.memory_space<vmem>>, %arg6: memref<1x1x2xf32, #tpu.memory_space<vmem>>) attributes {dimension_semantics = [#tpu.dimension_semantics<parallel>], iteration_bounds = array<i64: 1>, scalar_prefetch = 0 : i64, scratch_operands = 0 : i64, tpu.core_type = #tpu.core_type<tc>, window_params = [{transform_indices = @transform_0, window_bounds = array<i64: 2, 5000>}, {pipeline_mode = #tpu.pipeline_mode<synchronous>, transform_indices = @transform_1, window_bounds = array<i64: 5000, 32>}, {pipeline_mode = #tpu.pipeline_mode<synchronous>, transform_indices = @transform_2, window_bounds = array<i64: 1, 32>}, {pipeline_mode = #tpu.pipeline_mode<synchronous>, transform_indices = @transform_3, window_bounds = array<i64: 1, 32>}, {pipeline_mode = #tpu.pipeline_mode<synchronous>, transform_indices = @transform_4, window_bounds = array<i64: 1, 1>}, {transform_indices = @transform_5, window_bounds = array<i64: 1, 1, 2>}]} {
    %c0 = arith.constant 0 : index
    %c0_0 = arith.constant 0 : index
    %0 = vector.load %arg1[%c0, %c0_0] : memref<2x5000xf32, #tpu.memory_space<vmem>>, vector<2x5000xf32>
    %1 = arith.truncf %0 : vector<2x5000xf32> to vector<2x5000xbf16>
    %c0_1 = arith.constant 0 : index
    %c0_2 = arith.constant 0 : index
    %2 = vector.load %arg2[%c0_1, %c0_2] : memref<5000x32xbf16, #tpu.memory_space<vmem>>, vector<5000x32xbf16>
    %cst = arith.constant dense<0.000000e+00> : vector<2x32xf32>
    %3 = tpu.matmul %1, %2, %cst {dimension_numbers = #tpu.dot_dimension_numbers<[1], [0], [0], [1], [0, 0, 1, 1], [], []>} : vector<2x5000xbf16>, vector<5000x32xbf16>, vector<2x32xf32> -> vector<2x32xf32>
    %c0_3 = arith.constant 0 : index
    %c0_4 = arith.constant 0 : index
    %4 = vector.load %arg3[%c0_3, %c0_4] : memref<1x32xf32, #tpu.memory_space<vmem>>, vector<1x32xf32>
    %5 = vector.broadcast %4 : vector<1x32xf32> to vector<2x32xf32>
    %6 = arith.addf %3, %5 : vector<2x32xf32>
    %c0_5 = arith.constant 0 : index
    %c0_6 = arith.constant 0 : index
    %7 = vector.load %arg4[%c0_5, %c0_6] : memref<1x32xf32, #tpu.memory_space<vmem>>, vector<1x32xf32>
    %cst_7 = arith.constant dense<0.000000e+00> : vector<1x2xf32>
    %8 = tpu.matmul %7, %6, %cst_7 {dimension_numbers = #tpu.dot_dimension_numbers<[1], [1], [0], [0], [0, 0, 1, 0], [], []>} : vector<1x32xf32>, vector<2x32xf32>, vector<1x2xf32> -> vector<1x2xf32>
    %c0_8 = arith.constant 0 : index
    %c0_9 = arith.constant 0 : index
    %9 = vector.load %arg5[%c0_8, %c0_9] : memref<1x1xf32, #tpu.memory_space<vmem>>, vector<1x1xf32>
    %10 = vector.broadcast %9 : vector<1x1xf32> to vector<1x2xf32>
    %11 = arith.addf %8, %10 : vector<1x2xf32>
    %12 = math.absf %11 : vector<1x2xf32>
    %cst_10 = arith.constant 0.000000e+00 : f32
    %13 = vector.broadcast %cst_10 : f32 to vector<1x2xf32>
    %14 = arith.subf %13, %12 : vector<1x2xf32>
    %15 = math.exp %14 : vector<1x2xf32>
    %cst_11 = arith.constant 0.000000e+00 : f32
    %16 = vector.broadcast %cst_11 : f32 to vector<1x2xf32>
    %17 = arith.cmpf oge, %11, %16 : vector<1x2xf32>
    %cst_12 = arith.constant 1.000000e+00 : f32
    %18 = vector.broadcast %cst_12 : f32 to vector<1x2xf32>
    %19 = arith.addf %18, %15 : vector<1x2xf32>
    %cst_13 = arith.constant 1.000000e+00 : f32
    %20 = vector.broadcast %cst_13 : f32 to vector<1x2xf32>
    %21 = arith.divf %20, %19 : vector<1x2xf32>
    %cst_14 = arith.constant 1.000000e+00 : f32
    %22 = vector.broadcast %cst_14 : f32 to vector<1x2xf32>
    %23 = arith.addf %22, %15 : vector<1x2xf32>
    %24 = arith.divf %15, %23 : vector<1x2xf32>
    %25 = arith.select %17, %21, %24 : vector<1x2xi1>, vector<1x2xf32>
    %26 = vector.shape_cast %25 : vector<1x2xf32> to vector<1x1x2xf32>
    %c0_15 = arith.constant 0 : index
    %c0_16 = arith.constant 0 : index
    %c0_17 = arith.constant 0 : index
    %27 = vector.load %arg6[%c0_15, %c0_16, %c0_17] : memref<1x1x2xf32, #tpu.memory_space<vmem>>, vector<1x1x2xf32>
    tpu.vector_store %arg6[%c0_15, %c0_16, %c0_17], %26 {strides = array<i32>} : memref<1x1x2xf32, #tpu.memory_space<vmem>>, vector<1x1x2xf32>,
    return
  }
  func.func @transform_0(%arg0: i32) -> (i32, i32) {
    %c0_i32 = arith.constant 0 : i32
    %c0_i32_0 = arith.constant 0 : i32
    return %arg0, %c0_i32 : i32, i32
  }
  func.func @transform_1(%arg0: i32) -> (i32, i32) {
    %c0_i32 = arith.constant 0 : i32
    %c0_i32_0 = arith.constant 0 : i32
    %c0_i32_1 = arith.constant 0 : i32
    return %c0_i32, %c0_i32_0 : i32, i32
  }
  func.func @transform_2(%arg0: i32) -> (i32, i32) {
    %c0_i32 = arith.constant 0 : i32
    %c0_i32_0 = arith.constant 0 : i32
    %c0_i32_1 = arith.constant 0 : i32
    return %c0_i32, %c0_i32_0 : i32, i32
  }
  func.func @transform_3(%arg0: i32) -> (i32, i32) {
    %c0_i32 = arith.constant 0 : i32
    %c0_i32_0 = arith.constant 0 : i32
    %c0_i32_1 = arith.constant 0 : i32
    return %c0_i32, %c0_i32_0 : i32, i32
  }
  func.func @transform_4(%arg0: i32) -> (i32, i32) {
    %c0_i32 = arith.constant 0 : i32
    %c0_i32_0 = arith.constant 0 : i32
    %c0_i32_1 = arith.constant 0 : i32
    return %c0_i32, %c0_i32_0 : i32, i32
  }
  func.func @transform_5(%arg0: i32) -> (i32, i32, i32) {
    %c0_i32 = arith.constant 0 : i32
    %c0_i32_0 = arith.constant 0 : i32
    %c0_i32_1 = arith.constant 0 : i32
    return %arg0, %c0_i32, %c0_i32_0 : i32, i32, i32
  }
}

</mosaic_0001>

<bundles_post_ra>
// kernel: tpu_custom_call.1
= control target key start
LH: loop header
LB: loop body
LE: loop exit
PB: predicated region body
PF: predicated region fallthrough
CT: control target
= control target key end

     0   :  { %s5890_s0 = inlined_call_operand.vmem [shape: f32[2,5000], index: 0, kind: input, shape index: {}]   ;;  %s5891_s1 = inlined_call_operand.vmem [shape: bf16[5000,32], index: 1, kind: input, shape index: {}]   ;;  %s5892_s2 = inlined_call_operand.vmem [shape: f32[1,32], index: 2, kind: input, shape index: {}]   ;;  %s5893_s3 = inlined_call_operand.vmem [shape: f32[1,32], index: 3, kind: input, shape index: {}]   ;;  %s5894_s4 = inlined_call_operand.<no memory space> [shape: f32[1,1], index: 4, kind: input, shape index: {}]   ;;  %s5895_s5 = inlined_call_operand.hbm [shape: f32[1,1,2], index: 5, kind: output, shape index: {}]  }
   0x1   :  { %v10_v0 = vstv %s5894_s4 }
   0x2   :  { %11 = vst [vmem:[#allocation2] sm:$0x1] %v10_v0 }
   0x3   :  { %v4471_v1 = vld [vmem:[%s5891_s1 + $0x40] sm:$0xff]   ;;  %v4475_v5 = vld [vmem:[%s5891_s1 + $0x48] sm:$0xff]   ;;  %v4479_v9 = vld [vmem:[%s5891_s1 + $0x50] sm:$0xff]   ;;  %v48_v29 = vlaneseq  ;;  %v4822_v37 = vmov 1983009808  }
   0x4   :  { %v4472_v2 = vld [vmem:[%s5891_s1 + $0xc0] sm:$0xff]   ;;  %4040 = vmatprep.subr.bf16.mxu0 %v4471_v1  ;;  %v4476_v6 = vld [vmem:[%s5891_s1 + $0xc8] sm:$0xff]   ;;  %v4480_v10 = vld [vmem:[%s5891_s1 + $0xd0] sm:$0xff]   ;;  %v46_v38 = vunpack.c.l.s4 %v4822_v37 }
   0x5   :  { %v4473_v3 = vld [vmem:[%s5891_s1] sm:$0xff]   ;;  %4062 = vmatprep.subr.bf16.mxu1 %v4472_v2  ;;  %v4477_v7 = vld [vmem:[%s5891_s1 + $0x8] sm:$0xff]   ;;  %v4481_v11 = vld [vmem:[%s5891_s1 + $0x10] sm:$0xff]   ;;  %v4956_v34 = vshrl.u32 %v48_v29, 7 }
   0x6   :  { %v4474_v4 = vld [vmem:[%s5891_s1 + $0x80] sm:$0xff]   ;;  %4041 = vmatpush3.bf16.msra.mxu0 %v4473_v3  ;;  %v4478_v8 = vld [vmem:[%s5891_s1 + $0x88] sm:$0xff]   ;;  %v4482_v12 = vld [vmem:[%s5891_s1 + $0x90] sm:$0xff]   ;;  %v47_v40 = vunpack.c.0.s8 %v46_v38 }
   0x7   :  { %4063 = vmatpush3.bf16.msra.mxu1 %v4474_v4  ;;  %4042 = vmatprep.subr.bf16.mxu0 %v4475_v5  ;;  %v4483_v13 = vld [vmem:[%s5891_s1 + $0x58] sm:$0xff]   ;;  %v4487_v17 = vld [vmem:[%s5891_s1 + $0x60] sm:$0xff]   ;;  %v4491_v21 = vld [vmem:[%s5891_s1 + $0x68] sm:$0xff]  }
   0x8   :  { %4064 = vmatprep.subr.bf16.mxu1 %v4476_v6  ;;  %v4484_v14 = vld [vmem:[%s5891_s1 + $0xd8] sm:$0xff]   ;;  %v4488_v18 = vld [vmem:[%s5891_s1 + $0xe0] sm:$0xff]   ;;  %v4492_v22 = vld [vmem:[%s5891_s1 + $0xe8] sm:$0xff]   ;;  %v4968_v42 = vsub.s32 %v47_v40, %v4956_v34 }
   0x9   :  { %v4485_v15 = vld [vmem:[%s5891_s1 + $0x18] sm:$0xff]   ;;  %v4489_v19 = vld [vmem:[%s5891_s1 + $0x20] sm:$0xff]   ;;  %v4493_v23 = vld [vmem:[%s5891_s1 + $0x28] sm:$0xff]  }
   0xa   :  { %4043 = vmatpush3.bf16.msra.mxu0 %v4477_v7  ;;  %v4486_v16 = vld [vmem:[%s5891_s1 + $0x98] sm:$0xff]   ;;  %v4490_v20 = vld [vmem:[%s5891_s1 + $0xa0] sm:$0xff]   ;;  %v4494_v24 = vld [vmem:[%s5891_s1 + $0xa8] sm:$0xff]  }
   0xb   :  { %4065 = vmatpush3.bf16.msra.mxu1 %v4478_v8  ;;  %4044 = vmatprep.subr.bf16.mxu0 %v4479_v9  ;;  %v4495_v25 = vld [vmem:[%s5891_s1 + $0x70] sm:$0xff]   ;;  %v4499_v30 = vld [vmem:[%s5891_s1 + $0x78] sm:$0xff]   ;;  %v24_v35 = vld [vmem:[%s5890_s0] sm:$0xff] }
   0xc   :  { %4066 = vmatprep.subr.bf16.mxu1 %v4480_v10  ;;  %v4496_v26 = vld [vmem:[%s5891_s1 + $0xf0] sm:$0xff]   ;;  %v4500_v31 = vld [vmem:[%s5891_s1 + $0xf8] sm:$0xff]   ;;  %v4504_v36 = vld [vmem:[%s5891_s1 + $0x140] sm:$0xff]   ;;  %v44_v41 = vcombine.high %v24_v35, %v24_v35  ;;  %v51_v43 = vrot.slane %v24_v35, %v4968_v42 }
   0xd   :  { %v4497_v27 = vld [vmem:[%s5891_s1 + $0x30] sm:$0xff]   ;;  %v4501_v32 = vld [vmem:[%s5891_s1 + $0x38] sm:$0xff]   ;;  %v4505_v39 = vld [vmem:[%s5891_s1 + $0x1c0] sm:$0xff]  }
   0xe   :  { %4045 = vmatpush3.bf16.msra.mxu0 %v4481_v11  ;;  %v4498_v28 = vld [vmem:[%s5891_s1 + $0xb0] sm:$0xff]   ;;  %v4502_v33 = vld [vmem:[%s5891_s1 + $0xb8] sm:$0xff]   ;;  %v58_v44 = vrot.slane %v44_v41, %v4968_v42  ;;  %v59_v45 = vcombine.high %v51_v43, %v51_v43  ;;  %v4506_v47 = vld [vmem:[%s5891_s1 + $0x100] sm:$0xff]   ;;  %v254_v48 = vpack.c.bf16 %v51_v43, %v51_v43 }
   0xf   :  { %4067 = vmatpush3.bf16.msra.mxu1 %v4482_v12  ;;  %4046 = vmatprep.subr.bf16.mxu0 %v4483_v13  ;;  %v4507_v50 = vld [vmem:[%s5891_s1 + $0x180] sm:$0xff]   ;;  %v4508_v53 = vld [vmem:[%s5891_s1 + $0x148] sm:$0xff]   ;;  %v4512_v57 = vld [vmem:[%s5891_s1 + $0x150] sm:$0xff]  }
  0x10   :  { %4068 = vmatprep.subr.bf16.mxu1 %v4484_v14  ;;  %v60_v46 = vcombine.high %v58_v44, %v58_v44  ;;  %v256_v49 = vpack.c.bf16 %v58_v44, %v58_v44  ;;  %v255_v51 = vpack.c.bf16 %v59_v45, %v59_v45  ;;  %v4509_v54 = vld [vmem:[%s5891_s1 + $0x1c8] sm:$0xff]   ;;  %v4513_v58 = vld [vmem:[%s5891_s1 + $0x1d0] sm:$0xff]   ;;  %v4516_v61 = vld [vmem:[%s5891_s1 + $0x158] sm:$0xff]  }
  0x11   :  { %v4510_v55 = vld [vmem:[%s5891_s1 + $0x108] sm:$0xff]   ;;  %v4514_v59 = vld [vmem:[%s5891_s1 + $0x110] sm:$0xff]   ;;  %v4517_v62 = vld [vmem:[%s5891_s1 + $0x1d8] sm:$0xff]  }
  0x12   :  { %4047 = vmatpush3.bf16.msra.mxu0 %v4485_v15  ;;  %v257_v52 = vpack.c.bf16 %v60_v46, %v60_v46  ;;  %2841 = vmatprep.mubr.bf16.mxu0 %v255_v51  ;;  %v4511_v56 = vld [vmem:[%s5891_s1 + $0x188] sm:$0xff]   ;;  %v4515_v60 = vld [vmem:[%s5891_s1 + $0x190] sm:$0xff]   ;;  %v4518_v63 = vld [vmem:[%s5891_s1 + $0x118] sm:$0xff]  }
  0x13   :  { %4069 = vmatpush3.bf16.msra.mxu1 %v4486_v16  ;;  %4048 = vmatprep.subr.bf16.mxu0 %v4487_v17  ;;  %v4519_v0 = vld [vmem:[%s5891_s1 + $0x198] sm:$0xff]   ;;  %v4520_v1 = vld [vmem:[%s5891_s1 + $0x160] sm:$0xff]   ;;  %v4524_v5 = vld [vmem:[%s5891_s1 + $0x168] sm:$0xff]  }
  0x14   :  { %4070 = vmatprep.subr.bf16.mxu1 %v4488_v18  ;;  %2881 = vmatprep.mubr.bf16.mxu1 %v257_v52  ;;  %v4521_v2 = vld [vmem:[%s5891_s1 + $0x1e0] sm:$0xff]   ;;  %v4525_v6 = vld [vmem:[%s5891_s1 + $0x1e8] sm:$0xff]   ;;  %v4528_v9 = vld [vmem:[%s5891_s1 + $0x170] sm:$0xff]  }
  0x15   :  { %v4522_v3 = vld [vmem:[%s5891_s1 + $0x120] sm:$0xff]   ;;  %v4526_v7 = vld [vmem:[%s5891_s1 + $0x128] sm:$0xff]   ;;  %v4529_v10 = vld [vmem:[%s5891_s1 + $0x1f0] sm:$0xff]  }
  0x16   :  { %4049 = vmatpush3.bf16.msra.mxu0 %v4489_v19  ;;  %v4523_v4 = vld [vmem:[%s5891_s1 + $0x1a0] sm:$0xff]   ;;  %v4527_v8 = vld [vmem:[%s5891_s1 + $0x1a8] sm:$0xff]   ;;  %v4530_v12 = vld [vmem:[%s5891_s1 + $0x130] sm:$0xff]  }
  0x17   :  { %4071 = vmatpush3.bf16.msra.mxu1 %v4490_v20  ;;  %4050 = vmatprep.subr.bf16.mxu0 %v4491_v21  ;;  %v25_v11 = vld [vmem:[%s5890_s0 + $0x8] sm:$0xff]  ;;  %v4531_v15 = vld [vmem:[%s5891_s1 + $0x1b0] sm:$0xff]   ;;  %v4532_v16 = vld [vmem:[%s5891_s1 + $0x178] sm:$0xff]  }
  0x18   :  { %4072 = vmatprep.subr.bf16.mxu1 %v4492_v22  ;;  %v68_v13 = vrot.slane %v25_v11, %v4968_v42  ;;  %v61_v14 = vcombine.high %v25_v11, %v25_v11  ;;  %v4533_v19 = vld [vmem:[%s5891_s1 + $0x1f8] sm:$0xff]   ;;  %v4544_v35 = vld [vmem:[%s5891_s1 + $0x288] sm:$0xff]   ;;  %v4546_v37 = vld [vmem:[%s5891_s1 + $0x2d0] sm:$0xff]  }
  0x19   :  { %v4534_v20 = vld [vmem:[%s5891_s1 + $0x138] sm:$0xff]   ;;  %v4547_v38 = vld [vmem:[%s5891_s1 + $0x210] sm:$0xff]   ;;  %v4553_v45 = vld [vmem:[%s5891_s1 + $0x260] sm:$0xff]  }
  0x1a   :  { %4051 = vmatpush3.bf16.msra.mxu0 %v4493_v23  ;;  %v76_v17 = vcombine.high %v68_v13, %v68_v13  ;;  %v75_v18 = vrot.slane %v61_v14, %v4968_v42  ;;  %v4535_v23 = vld [vmem:[%s5891_s1 + $0x1b8] sm:$0xff]   ;;  %v4554_v46 = vld [vmem:[%s5891_s1 + $0x2e0] sm:$0xff]   ;;  %v4559_v51 = vld [vmem:[%s5891_s1 + $0x228] sm:$0xff]  }
  0x1b   :  { %4073 = vmatpush3.bf16.msra.mxu1 %v4494_v24  ;;  %4052 = vmatprep.subr.bf16.mxu0 %v4495_v25  ;;  %v4537_v25 = vld [vmem:[%s5891_s1 + $0x240] sm:$0xff]   ;;  %v4549_v40 = vld [vmem:[%s5891_s1 + $0x258] sm:$0xff]   ;;  %v4560_v52 = vld [vmem:[%s5891_s1 + $0x2a8] sm:$0xff]  }
  0x1c   :  { %4074 = vmatprep.subr.bf16.mxu1 %v4496_v26  ;;  %v259_v21 = vpack.c.bf16 %v76_v17, %v76_v17  ;;  %v77_v22 = vcombine.high %v75_v18, %v75_v18  ;;  %v4538_v26 = vld [vmem:[%s5891_s1 + $0x2c0] sm:$0xff]   ;;  %v260_v29 = vpack.c.bf16 %v75_v18, %v75_v18  ;;  %v4550_v41 = vld [vmem:[%s5891_s1 + $0x2d8] sm:$0xff]   ;;  %v4574_v11 = vld [vmem:[%s5891_s1 + $0x348] sm:$0xff]  }
  0x1d   :  { %v4551_v43 = vld [vmem:[%s5891_s1 + $0x218] sm:$0xff]   ;;  %v4577_v14 = vld [vmem:[%s5891_s1 + $0x388] sm:$0xff]   ;;  %v4580_v17 = vld [vmem:[%s5891_s1 + $0x310] sm:$0xff]  }
  0x1e   :  { %4053 = vmatpush3.bf16.msra.mxu0 %v4497_v27  ;;  %v261_v24 = vpack.c.bf16 %v77_v22, %v77_v22  ;;  %v4539_v27 = vld [vmem:[%s5891_s1 + $0x200] sm:$0xff]   ;;  %v4552_v44 = vld [vmem:[%s5891_s1 + $0x298] sm:$0xff]   ;;  %v4581_v18 = vld [vmem:[%s5891_s1 + $0x390] sm:$0xff]  }
  0x1f   :  { %4075 = vmatpush3.bf16.msra.mxu1 %v4498_v28  ;;  %4054 = vmatprep.subr.bf16.mxu0 %v4499_v30  ;;  %v258_v28 = vpack.c.bf16 %v68_v13, %v68_v13  ;;  %v4540_v30 = vld [vmem:[%s5891_s1 + $0x280] sm:$0xff]   ;;  %v4576_v13 = vld [vmem:[%s5891_s1 + $0x308] sm:$0xff]   ;;  %v4585_v22 = vld [vmem:[%s5891_s1 + $0x398] sm:$0xff]  }
  0x20   :  { %4076 = vmatprep.subr.bf16.mxu1 %v4500_v31  ;;  %v4541_v31 = vld [vmem:[%s5891_s1 + $0x248] sm:$0xff]  }
  0x22   :  { %4055 = vmatpush3.bf16.msra.mxu0 %v4501_v32  ;;  %v4542_v32 = vld [vmem:[%s5891_s1 + $0x2c8] sm:$0xff]  }
  0x23   :  { %4077 = vmatpush3.bf16.msra.mxu1 %v4502_v33  ;;  %4084 = vmatprep.subr.bf16.mxu0 %v4504_v36  ;;  %v4543_v33 = vld [vmem:[%s5891_s1 + $0x208] sm:$0xff]   ;;  %v4545_v36 = vld [vmem:[%s5891_s1 + $0x250] sm:$0xff]  }
  0x24   :  { %4106 = vmatprep.subr.bf16.mxu1 %v4505_v39  ;;  %v4548_v39 = vld [vmem:[%s5891_s1 + $0x290] sm:$0xff]  }
  0x25   :  { %2842 = vmatmul.mubr.bf16.vlgmr.msra.gmra.mrb[0].mxu0 %v254_v48  ;;  %v4556_v48 = vld [vmem:[%s5891_s1 + $0x2a0] sm:$0xff]  }
  0x26   :  { %2882 = vmatmul.mubr.bf16.vlgmr.msra.gmra.mrb[0].mxu1 %v256_v49  ;;  %4085 = vmatpush3.bf16.msra.mxu0 %v4506_v47  ;;  %v4555_v47 = vld [vmem:[%s5891_s1 + $0x220] sm:$0xff]   ;;  %v4557_v49 = vld [vmem:[%s5891_s1 + $0x268] sm:$0xff]  }
  0x27   :  { %4107 = vmatpush3.bf16.msra.mxu1 %v4507_v50  ;;  %4086 = vmatprep.subr.bf16.mxu0 %v4508_v53  ;;  %v4558_v50 = vld [vmem:[%s5891_s1 + $0x2e8] sm:$0xff]   ;;  %v4561_v53 = vld [vmem:[%s5891_s1 + $0x270] sm:$0xff]  }
  0x28   :  { %4108 = vmatprep.subr.bf16.mxu1 %v4509_v54  ;;  %2921 = vmatprep.mubr.bf16.mxu0 %v259_v21  ;;  %v4562_v54 = vld [vmem:[%s5891_s1 + $0x2f0] sm:$0xff]   ;;  %v4584_v21 = vld [vmem:[%s5891_s1 + $0x318] sm:$0xff]  }
  0x29   :  { %2961 = vmatprep.mubr.bf16.mxu1 %v261_v24  ;;  %v4587_v24 = vld [vmem:[%s5891_s1 + $0x3e0] sm:$0xff]  }
  0x2a   :  { %4087 = vmatpush3.bf16.msra.mxu0 %v4510_v55  ;;  %v26_v55 = vld [vmem:[%s5890_s0 + $0x10] sm:$0xff] }
  0x2b   :  { %4109 = vmatpush3.bf16.msra.mxu1 %v4511_v56  ;;  %4088 = vmatprep.subr.bf16.mxu0 %v4512_v57  ;;  %v4563_v56 = vld [vmem:[%s5891_s1 + $0x230] sm:$0xff]   ;;  %v85_v57 = vrot.slane %v26_v55, %v4968_v42 }
  0x2c   :  { %4110 = vmatprep.subr.bf16.mxu1 %v4513_v58  ;;  %v78_v58 = vcombine.high %v26_v55, %v26_v55  ;;  %v4607_v55 = vld [vmem:[%s5891_s1 + $0x448] sm:$0xff]  }
  0x2e   :  { %4089 = vmatpush3.bf16.msra.mxu0 %v4514_v59  ;;  %v4564_v59 = vld [vmem:[%s5891_s1 + $0x2b0] sm:$0xff]  }
  0x2f   :  { %4111 = vmatpush3.bf16.msra.mxu1 %v4515_v60  ;;  %4090 = vmatprep.subr.bf16.mxu0 %v4516_v61  ;;  %v4565_v60 = vld [vmem:[%s5891_s1 + $0x278] sm:$0xff]   ;;  %v93_v61 = vcombine.high %v85_v57, %v85_v57 }
  0x30   :  { %4112 = vmatprep.subr.bf16.mxu1 %v4517_v62  ;;  %v92_v62 = vrot.slane %v78_v58, %v4968_v42  ;;  %v4610_v58 = vld [vmem:[%s5891_s1 + $0x488] sm:$0xff]  }
  0x32   :  { %4091 = vmatpush3.bf16.msra.mxu0 %v4518_v63  ;;  %v4566_v63 = vld [vmem:[%s5891_s1 + $0x2f8] sm:$0xff]  }
  0x33   :  { %4113 = vmatpush3.bf16.msra.mxu1 %v4519_v0  ;;  %4092 = vmatprep.subr.bf16.mxu0 %v4520_v1  ;;  %v4567_v0 = vld [vmem:[%s5891_s1 + $0x238] sm:$0xff]   ;;  %v263_v1 = vpack.c.bf16 %v93_v61, %v93_v61  ;;  %v4613_v61 = vld [vmem:[%s5891_s1 + $0x410] sm:$0xff]  }
  0x34   :  { %4114 = vmatprep.subr.bf16.mxu1 %v4521_v2  ;;  %v94_v2 = vcombine.high %v92_v62, %v92_v62 }
  0x36   :  { %4093 = vmatpush3.bf16.msra.mxu0 %v4522_v3  ;;  %v4568_v3 = vld [vmem:[%s5891_s1 + $0x2b8] sm:$0xff]  }
  0x37   :  { %4115 = vmatpush3.bf16.msra.mxu1 %v4523_v4  ;;  %4094 = vmatprep.subr.bf16.mxu0 %v4524_v5  ;;  %v265_v4 = vpack.c.bf16 %v94_v2, %v94_v2  ;;  %v4570_v5 = vld [vmem:[%s5891_s1 + $0x340] sm:$0xff]   ;;  %v4618_v2 = vld [vmem:[%s5891_s1 + $0x498] sm:$0xff]  }
  0x38   :  { %4116 = vmatprep.subr.bf16.mxu1 %v4525_v6  ;;  %v4571_v6 = vld [vmem:[%s5891_s1 + $0x3c0] sm:$0xff]  }
  0x3a   :  { %4095 = vmatpush3.bf16.msra.mxu0 %v4526_v7  ;;  %v4572_v7 = vld [vmem:[%s5891_s1 + $0x300] sm:$0xff]  }
  0x3b   :  { %4117 = vmatpush3.bf16.msra.mxu1 %v4527_v8  ;;  %4096 = vmatprep.subr.bf16.mxu0 %v4528_v9  ;;  %v262_v8 = vpack.c.bf16 %v85_v57, %v85_v57  ;;  %v264_v9 = vpack.c.bf16 %v92_v62, %v92_v62  ;;  %v4609_v57 = vld [vmem:[%s5891_s1 + $0x408] sm:$0xff]   ;;  %v4614_v62 = vld [vmem:[%s5891_s1 + $0x490] sm:$0xff]  }
  0x3c   :  { %4118 = vmatprep.subr.bf16.mxu1 %v4529_v10  ;;  %v4573_v10 = vld [vmem:[%s5891_s1 + $0x380] sm:$0xff]  }
  0x3e   :  { %4097 = vmatpush3.bf16.msra.mxu0 %v4530_v12  ;;  %v4575_v12 = vld [vmem:[%s5891_s1 + $0x3c8] sm:$0xff]  }
  0x3f   :  { %4119 = vmatpush3.bf16.msra.mxu1 %v4531_v15  ;;  %4098 = vmatprep.subr.bf16.mxu0 %v4532_v16  ;;  %v4578_v15 = vld [vmem:[%s5891_s1 + $0x350] sm:$0xff]  }
  0x40   :  { %4120 = vmatprep.subr.bf16.mxu1 %v4533_v19  ;;  %v4579_v16 = vld [vmem:[%s5891_s1 + $0x3d0] sm:$0xff]   ;;  %v4582_v19 = vld [vmem:[%s5891_s1 + $0x358] sm:$0xff]  }
  0x42   :  { %4099 = vmatpush3.bf16.msra.mxu0 %v4534_v20  ;;  %v4583_v20 = vld [vmem:[%s5891_s1 + $0x3d8] sm:$0xff]  }
  0x43   :  { %4121 = vmatpush3.bf16.msra.mxu1 %v4535_v23  ;;  %4128 = vmatprep.subr.bf16.mxu0 %v4537_v25  ;;  %v4586_v23 = vld [vmem:[%s5891_s1 + $0x360] sm:$0xff]  }
  0x44   :  { %4150 = vmatprep.subr.bf16.mxu1 %v4538_v26  ;;  %v4588_v25 = vld [vmem:[%s5891_s1 + $0x320] sm:$0xff]  }
  0x45   :  { %2922 = vmatmul.mubr.bf16.vlgmr.msra.gmra.mrb[4].mxu0 %v258_v28  ;;  %v4589_v26 = vld [vmem:[%s5891_s1 + $0x3a0] sm:$0xff]   ;;  %v4591_v28 = vld [vmem:[%s5891_s1 + $0x3e8] sm:$0xff]  }
  0x46   :  { %2962 = vmatmul.mubr.bf16.vlgmr.msra.gmra.mrb[4].mxu1 %v260_v29  ;;  %4129 = vmatpush3.bf16.msra.mxu0 %v4539_v27  ;;  %v4590_v27 = vld [vmem:[%s5891_s1 + $0x368] sm:$0xff]  }
  0x47   :  { %4151 = vmatpush3.bf16.msra.mxu1 %v4540_v30  ;;  %4130 = vmatprep.subr.bf16.mxu0 %v4541_v31  ;;  %v4592_v29 = vld [vmem:[%s5891_s1 + $0x328] sm:$0xff]   ;;  %v4594_v31 = vld [vmem:[%s5891_s1 + $0x370] sm:$0xff]  }
  0x48   :  { %4152 = vmatprep.subr.bf16.mxu1 %v4542_v32  ;;  %3001 = vmatprep.mubr.bf16.mxu0 %v263_v1  ;;  %v4593_v30 = vld [vmem:[%s5891_s1 + $0x3a8] sm:$0xff]   ;;  %v4595_v32 = vld [vmem:[%s5891_s1 + $0x3f0] sm:$0xff]   ;;  %v4617_v1 = vld [vmem:[%s5891_s1 + $0x418] sm:$0xff]  }
  0x49   :  { %3041 = vmatprep.mubr.bf16.mxu1 %v265_v4  ;;  %v4620_v4 = vld [vmem:[%s5891_s1 + $0x4e0] sm:$0xff]  }
  0x4a   :  { %4131 = vmatpush3.bf16.msra.mxu0 %v4543_v33  ;;  %v4596_v33 = vld [vmem:[%s5891_s1 + $0x330] sm:$0xff]  }
  0x4b   :  { %4153 = vmatpush3.bf16.msra.mxu1 %v4544_v35  ;;  %4132 = vmatprep.subr.bf16.mxu0 %v4545_v36  ;;  %v27_v35 = vld [vmem:[%s5890_s0 + $0x18] sm:$0xff]  ;;  %v4597_v36 = vld [vmem:[%s5891_s1 + $0x3b0] sm:$0xff]  }
  0x4c   :  { %4154 = vmatprep.subr.bf16.mxu1 %v4546_v37  ;;  %v102_v37 = vrot.slane %v27_v35, %v4968_v42 }
  0x4e   :  { %4133 = vmatpush3.bf16.msra.mxu0 %v4547_v38  ;;  %v95_v38 = vcombine.high %v27_v35, %v27_v35  ;;  %v4641_v35 = vld [vmem:[%s5891_s1 + $0x5c8] sm:$0xff]  }
  0x4f   :  { %4155 = vmatpush3.bf16.msra.mxu1 %v4548_v39  ;;  %4134 = vmatprep.subr.bf16.mxu0 %v4549_v40  ;;  %v4598_v39 = vld [vmem:[%s5891_s1 + $0x378] sm:$0xff]  }
  0x50   :  { %4156 = vmatprep.subr.bf16.mxu1 %v4550_v41  ;;  %v4599_v40 = vld [vmem:[%s5891_s1 + $0x3f8] sm:$0xff]   ;;  %v110_v41 = vcombine.high %v102_v37, %v102_v37 }
  0x52   :  { %4135 = vmatpush3.bf16.msra.mxu0 %v4551_v43  ;;  %v109_v43 = vrot.slane %v95_v38, %v4968_v42  ;;  %v4644_v38 = vld [vmem:[%s5891_s1 + $0x550] sm:$0xff]  }
  0x53   :  { %4157 = vmatpush3.bf16.msra.mxu1 %v4552_v44  ;;  %4136 = vmatprep.subr.bf16.mxu0 %v4553_v45  ;;  %v4600_v44 = vld [vmem:[%s5891_s1 + $0x338] sm:$0xff]  }
  0x54   :  { %4158 = vmatprep.subr.bf16.mxu1 %v4554_v46  ;;  %v4601_v45 = vld [vmem:[%s5891_s1 + $0x3b8] sm:$0xff]   ;;  %v267_v46 = vpack.c.bf16 %v110_v41, %v110_v41  ;;  %v4823_v41 = vmov 0  }
  0x55   :  { %4470 = vset.pattern.permute.xlu0 %v4823_v41 }
  0x56   :  { %4137 = vmatpush3.bf16.msra.mxu0 %v4555_v47  ;;  %v111_v47 = vcombine.high %v109_v43, %v109_v43 }
  0x57   :  { %4159 = vmatpush3.bf16.msra.mxu1 %v4556_v48  ;;  %4138 = vmatprep.subr.bf16.mxu0 %v4557_v49  ;;  %v4603_v48 = vld [vmem:[%s5891_s1 + $0x440] sm:$0xff]  }
  0x58   :  { %4160 = vmatprep.subr.bf16.mxu1 %v4558_v50  ;;  %v269_v49 = vpack.c.bf16 %v111_v47, %v111_v47  ;;  %v4604_v50 = vld [vmem:[%s5891_s1 + $0x4c0] sm:$0xff]   ;;  %v4651_v47 = vld [vmem:[%s5891_s1 + $0x598] sm:$0xff]  }
  0x5a   :  { %4139 = vmatpush3.bf16.msra.mxu0 %v4559_v51  ;;  %v4605_v51 = vld [vmem:[%s5891_s1 + $0x400] sm:$0xff]  }
  0x5b   :  { %4161 = vmatpush3.bf16.msra.mxu1 %v4560_v52  ;;  %4140 = vmatprep.subr.bf16.mxu0 %v4561_v53  ;;  %v266_v52 = vpack.c.bf16 %v102_v37, %v102_v37  ;;  %v268_v53 = vpack.c.bf16 %v109_v43, %v109_v43  ;;  %v4643_v37 = vld [vmem:[%s5891_s1 + $0x588] sm:$0xff]   ;;  %v4647_v43 = vld [vmem:[%s5891_s1 + $0x590] sm:$0xff]  }
  0x5c   :  { %4162 = vmatprep.subr.bf16.mxu1 %v4562_v54  ;;  %v4606_v54 = vld [vmem:[%s5891_s1 + $0x480] sm:$0xff]  }
  0x5e   :  { %4141 = vmatpush3.bf16.msra.mxu0 %v4563_v56  ;;  %v4608_v56 = vld [vmem:[%s5891_s1 + $0x4c8] sm:$0xff]  }
  0x5f   :  { %4163 = vmatpush3.bf16.msra.mxu1 %v4564_v59  ;;  %4142 = vmatprep.subr.bf16.mxu0 %v4565_v60  ;;  %v4611_v59 = vld [vmem:[%s5891_s1 + $0x450] sm:$0xff]  }
  0x60   :  { %4164 = vmatprep.subr.bf16.mxu1 %v4566_v63  ;;  %v4612_v60 = vld [vmem:[%s5891_s1 + $0x4d0] sm:$0xff]   ;;  %v4615_v63 = vld [vmem:[%s5891_s1 + $0x458] sm:$0xff]  }
  0x62   :  { %4143 = vmatpush3.bf16.msra.mxu0 %v4567_v0  ;;  %v4616_v0 = vld [vmem:[%s5891_s1 + $0x4d8] sm:$0xff]  }
  0x63   :  { %4165 = vmatpush3.bf16.msra.mxu1 %v4568_v3  ;;  %4172 = vmatprep.subr.bf16.mxu0 %v4570_v5  ;;  %v4619_v3 = vld [vmem:[%s5891_s1 + $0x460] sm:$0xff]  }
  0x64   :  { %4194 = vmatprep.subr.bf16.mxu1 %v4571_v6  ;;  %v4621_v5 = vld [vmem:[%s5891_s1 + $0x420] sm:$0xff]  }
  0x65   :  { %3002 = vmatmul.mubr.bf16.vlgmr.msra.gmra.mrb[8].mxu0 %v262_v8  ;;  %v4622_v6 = vld [vmem:[%s5891_s1 + $0x4a0] sm:$0xff]   ;;  %v4624_v8 = vld [vmem:[%s5891_s1 + $0x4e8] sm:$0xff]  }
  0x66   :  { %3042 = vmatmul.mubr.bf16.vlgmr.msra.gmra.mrb[8].mxu1 %v264_v9  ;;  %4173 = vmatpush3.bf16.msra.mxu0 %v4572_v7  ;;  %v4623_v7 = vld [vmem:[%s5891_s1 + $0x468] sm:$0xff]  }
  0x67   :  { %4195 = vmatpush3.bf16.msra.mxu1 %v4573_v10  ;;  %4174 = vmatprep.subr.bf16.mxu0 %v4574_v11  ;;  %v4625_v9 = vld [vmem:[%s5891_s1 + $0x428] sm:$0xff]   ;;  %v4627_v11 = vld [vmem:[%s5891_s1 + $0x470] sm:$0xff]  }
  0x68   :  { %4196 = vmatprep.subr.bf16.mxu1 %v4575_v12  ;;  %3081 = vmatprep.mubr.bf16.mxu0 %v267_v46  ;;  %v4626_v10 = vld [vmem:[%s5891_s1 + $0x4a8] sm:$0xff]   ;;  %v4628_v12 = vld [vmem:[%s5891_s1 + $0x4f0] sm:$0xff]   ;;  %v4650_v46 = vld [vmem:[%s5891_s1 + $0x518] sm:$0xff]  }
  0x69   :  { %3121 = vmatprep.mubr.bf16.mxu1 %v269_v49  ;;  %v4653_v49 = vld [vmem:[%s5891_s1 + $0x5e0] sm:$0xff]  }
  0x6a   :  { %4175 = vmatpush3.bf16.msra.mxu0 %v4576_v13  ;;  %v4629_v13 = vld [vmem:[%s5891_s1 + $0x430] sm:$0xff]  }
  0x6b   :  { %4197 = vmatpush3.bf16.msra.mxu1 %v4577_v14  ;;  %4176 = vmatprep.subr.bf16.mxu0 %v4578_v15  ;;  %v28_v14 = vld [vmem:[%s5890_s0 + $0x20] sm:$0xff]  ;;  %v4630_v15 = vld [vmem:[%s5891_s1 + $0x4b0] sm:$0xff]  }
  0x6c   :  { %4198 = vmatprep.subr.bf16.mxu1 %v4579_v16  ;;  %v119_v16 = vrot.slane %v28_v14, %v4968_v42 }
  0x6e   :  { %4177 = vmatpush3.bf16.msra.mxu0 %v4580_v17  ;;  %v112_v17 = vcombine.high %v28_v14, %v28_v14  ;;  %v4673_v14 = vld [vmem:[%s5891_s1 + $0x648] sm:$0xff]  }
  0x6f   :  { %4199 = vmatpush3.bf16.msra.mxu1 %v4581_v18  ;;  %4178 = vmatprep.subr.bf16.mxu0 %v4582_v19  ;;  %v4631_v18 = vld [vmem:[%s5891_s1 + $0x478] sm:$0xff]  }
  0x70   :  { %4200 = vmatprep.subr.bf16.mxu1 %v4583_v20  ;;  %v4632_v19 = vld [vmem:[%s5891_s1 + $0x4f8] sm:$0xff]   ;;  %v127_v20 = vcombine.high %v119_v16, %v119_v16 }
  0x72   :  { %4179 = vmatpush3.bf16.msra.mxu0 %v4584_v21  ;;  %v126_v21 = vrot.slane %v112_v17, %v4968_v42  ;;  %v4676_v17 = vld [vmem:[%s5891_s1 + $0x688] sm:$0xff]  }
  0x73   :  { %4201 = vmatpush3.bf16.msra.mxu1 %v4585_v22  ;;  %4180 = vmatprep.subr.bf16.mxu0 %v4586_v23  ;;  %v4633_v22 = vld [vmem:[%s5891_s1 + $0x438] sm:$0xff]  }
  0x74   :  { %4202 = vmatprep.subr.bf16.mxu1 %v4587_v24  ;;  %v4634_v23 = vld [vmem:[%s5891_s1 + $0x4b8] sm:$0xff]   ;;  %v271_v24 = vpack.c.bf16 %v127_v20, %v127_v20  ;;  %v4679_v20 = vld [vmem:[%s5891_s1 + $0x610] sm:$0xff]  }
  0x76   :  { %4181 = vmatpush3.bf16.msra.mxu0 %v4588_v25  ;;  %v128_v25 = vcombine.high %v126_v21, %v126_v21 }
  0x77   :  { %4203 = vmatpush3.bf16.msra.mxu1 %v4589_v26  ;;  %4182 = vmatprep.subr.bf16.mxu0 %v4590_v27  ;;  %v4636_v26 = vld [vmem:[%s5891_s1 + $0x540] sm:$0xff]  }
  0x78   :  { %4204 = vmatprep.subr.bf16.mxu1 %v4591_v28  ;;  %v273_v27 = vpack.c.bf16 %v128_v25, %v128_v25  ;;  %v4637_v28 = vld [vmem:[%s5891_s1 + $0x5c0] sm:$0xff]   ;;  %v4684_v25 = vld [vmem:[%s5891_s1 + $0x698] sm:$0xff]  }
  0x7a   :  { %4183 = vmatpush3.bf16.msra.mxu0 %v4592_v29  ;;  %v4638_v29 = vld [vmem:[%s5891_s1 + $0x500] sm:$0xff]  }
  0x7b   :  { %4205 = vmatpush3.bf16.msra.mxu1 %v4593_v30  ;;  %4184 = vmatprep.subr.bf16.mxu0 %v4594_v31  ;;  %v270_v30 = vpack.c.bf16 %v119_v16, %v119_v16  ;;  %v272_v31 = vpack.c.bf16 %v126_v21, %v126_v21  ;;  %v4675_v16 = vld [vmem:[%s5891_s1 + $0x608] sm:$0xff]   ;;  %v4680_v21 = vld [vmem:[%s5891_s1 + $0x690] sm:$0xff]  }
  0x7c   :  { %4206 = vmatprep.subr.bf16.mxu1 %v4595_v32  ;;  %v4639_v32 = vld [vmem:[%s5891_s1 + $0x580] sm:$0xff]  }
  0x7e   :  { %4185 = vmatpush3.bf16.msra.mxu0 %v4596_v33  ;;  %v4640_v33 = vld [vmem:[%s5891_s1 + $0x548] sm:$0xff]  }
  0x7f   :  { %4207 = vmatpush3.bf16.msra.mxu1 %v4597_v36  ;;  %4186 = vmatprep.subr.bf16.mxu0 %v4598_v39  ;;  %v4642_v36 = vld [vmem:[%s5891_s1 + $0x508] sm:$0xff]   ;;  %v4645_v39 = vld [vmem:[%s5891_s1 + $0x5d0] sm:$0xff]  }
  0x80   :  { %4208 = vmatprep.subr.bf16.mxu1 %v4599_v40  ;;  %v4646_v40 = vld [vmem:[%s5891_s1 + $0x510] sm:$0xff]  }
  0x82   :  { %4187 = vmatpush3.bf16.msra.mxu0 %v4600_v44  ;;  %v4648_v44 = vld [vmem:[%s5891_s1 + $0x558] sm:$0xff]  }
  0x83   :  { %4209 = vmatpush3.bf16.msra.mxu1 %v4601_v45  ;;  %4216 = vmatprep.subr.bf16.mxu0 %v4603_v48  ;;  %v4649_v45 = vld [vmem:[%s5891_s1 + $0x5d8] sm:$0xff]   ;;  %v4652_v48 = vld [vmem:[%s5891_s1 + $0x560] sm:$0xff]  }
  0x84   :  { %4238 = vmatprep.subr.bf16.mxu1 %v4604_v50  ;;  %v4654_v50 = vld [vmem:[%s5891_s1 + $0x520] sm:$0xff]  }
  0x85   :  { %3082 = vmatmul.mubr.bf16.vlgmr.msra.gmra.mrb[12].mxu0 %v266_v52  ;;  %v4656_v52 = vld [vmem:[%s5891_s1 + $0x568] sm:$0xff]  }
  0x86   :  { %3122 = vmatmul.mubr.bf16.vlgmr.msra.gmra.mrb[12].mxu1 %v268_v53  ;;  %4217 = vmatpush3.bf16.msra.mxu0 %v4605_v51  ;;  %v4655_v51 = vld [vmem:[%s5891_s1 + $0x5a0] sm:$0xff]   ;;  %v4657_v53 = vld [vmem:[%s5891_s1 + $0x5e8] sm:$0xff]  }
  0x87   :  { %4239 = vmatpush3.bf16.msra.mxu1 %v4606_v54  ;;  %4218 = vmatprep.subr.bf16.mxu0 %v4607_v55  ;;  %v4658_v54 = vld [vmem:[%s5891_s1 + $0x528] sm:$0xff]  }
  0x88   :  { %4240 = vmatprep.subr.bf16.mxu1 %v4608_v56  ;;  %3161 = vmatprep.mubr.bf16.mxu0 %v271_v24  ;;  %v4659_v55 = vld [vmem:[%s5891_s1 + $0x5a8] sm:$0xff]   ;;  %v4660_v56 = vld [vmem:[%s5891_s1 + $0x570] sm:$0xff]   ;;  %v4683_v24 = vld [vmem:[%s5891_s1 + $0x618] sm:$0xff]  }
  0x89   :  { %3201 = vmatprep.mubr.bf16.mxu1 %v273_v27  ;;  %v4686_v27 = vld [vmem:[%s5891_s1 + $0x6e0] sm:$0xff]  }
  0x8a   :  { %4219 = vmatpush3.bf16.msra.mxu0 %v4609_v57  ;;  %v4661_v57 = vld [vmem:[%s5891_s1 + $0x5f0] sm:$0xff]  }
  0x8b   :  { %4241 = vmatpush3.bf16.msra.mxu1 %v4610_v58  ;;  %4220 = vmatprep.subr.bf16.mxu0 %v4611_v59  ;;  %v4662_v58 = vld [vmem:[%s5891_s1 + $0x530] sm:$0xff]   ;;  %v29_v59 = vld [vmem:[%s5890_s0 + $0x28] sm:$0xff] }
  0x8c   :  { %4242 = vmatprep.subr.bf16.mxu1 %v4612_v60  ;;  %v4663_v60 = vld [vmem:[%s5891_s1 + $0x5b0] sm:$0xff]  }
  0x8e   :  { %4221 = vmatpush3.bf16.msra.mxu0 %v4613_v61  ;;  %v136_v61 = vrot.slane %v29_v59, %v4968_v42 }
  0x8f   :  { %4243 = vmatpush3.bf16.msra.mxu1 %v4614_v62  ;;  %4222 = vmatprep.subr.bf16.mxu0 %v4615_v63  ;;  %v129_v62 = vcombine.high %v29_v59, %v29_v59  ;;  %v4664_v63 = vld [vmem:[%s5891_s1 + $0x578] sm:$0xff]   ;;  %v4706_v59 = vld [vmem:[%s5891_s1 + $0x748] sm:$0xff]  }
  0x90   :  { %4244 = vmatprep.subr.bf16.mxu1 %v4616_v0  ;;  %v4665_v0 = vld [vmem:[%s5891_s1 + $0x5f8] sm:$0xff]  }
  0x92   :  { %4223 = vmatpush3.bf16.msra.mxu0 %v4617_v1  ;;  %v144_v1 = vcombine.high %v136_v61, %v136_v61 }
  0x93   :  { %4245 = vmatpush3.bf16.msra.mxu1 %v4618_v2  ;;  %4224 = vmatprep.subr.bf16.mxu0 %v4619_v3  ;;  %v143_v2 = vrot.slane %v129_v62, %v4968_v42  ;;  %v4666_v3 = vld [vmem:[%s5891_s1 + $0x538] sm:$0xff]   ;;  %v4709_v62 = vld [vmem:[%s5891_s1 + $0x788] sm:$0xff]  }
  0x94   :  { %4246 = vmatprep.subr.bf16.mxu1 %v4620_v4  ;;  %v4667_v4 = vld [vmem:[%s5891_s1 + $0x5b8] sm:$0xff]  }
  0x96   :  { %4225 = vmatpush3.bf16.msra.mxu0 %v4621_v5  ;;  %v275_v5 = vpack.c.bf16 %v144_v1, %v144_v1  ;;  %v4712_v1 = vld [vmem:[%s5891_s1 + $0x710] sm:$0xff]  }
  0x97   :  { %4247 = vmatpush3.bf16.msra.mxu1 %v4622_v6  ;;  %4226 = vmatprep.subr.bf16.mxu0 %v4623_v7  ;;  %v145_v6 = vcombine.high %v143_v2, %v143_v2  ;;  %v4669_v7 = vld [vmem:[%s5891_s1 + $0x640] sm:$0xff]  }
  0x98   :  { %4248 = vmatprep.subr.bf16.mxu1 %v4624_v8 }
  0x99   :  { %v277_v8 = vpack.c.bf16 %v145_v6, %v145_v6  ;;  %v4717_v6 = vld [vmem:[%s5891_s1 + $0x798] sm:$0xff]  }
  0x9a   :  { %4227 = vmatpush3.bf16.msra.mxu0 %v4625_v9  ;;  %v4670_v9 = vld [vmem:[%s5891_s1 + $0x6c0] sm:$0xff]  }
  0x9b   :  { %4249 = vmatpush3.bf16.msra.mxu1 %v4626_v10  ;;  %4228 = vmatprep.subr.bf16.mxu0 %v4627_v11  ;;  %v4671_v10 = vld [vmem:[%s5891_s1 + $0x600] sm:$0xff]   ;;  %v274_v11 = vpack.c.bf16 %v136_v61, %v136_v61  ;;  %v4708_v61 = vld [vmem:[%s5891_s1 + $0x708] sm:$0xff]  }
  0x9c   :  { %4250 = vmatprep.subr.bf16.mxu1 %v4628_v12  ;;  %v276_v12 = vpack.c.bf16 %v143_v2, %v143_v2  ;;  %v4713_v2 = vld [vmem:[%s5891_s1 + $0x790] sm:$0xff]  }
  0x9e   :  { %4229 = vmatpush3.bf16.msra.mxu0 %v4629_v13  ;;  %v4672_v13 = vld [vmem:[%s5891_s1 + $0x680] sm:$0xff]  }
  0x9f   :  { %4251 = vmatpush3.bf16.msra.mxu1 %v4630_v15  ;;  %4230 = vmatprep.subr.bf16.mxu0 %v4631_v18  ;;  %v4674_v15 = vld [vmem:[%s5891_s1 + $0x6c8] sm:$0xff]   ;;  %v4677_v18 = vld [vmem:[%s5891_s1 + $0x650] sm:$0xff]  }
  0xa0   :  { %4252 = vmatprep.subr.bf16.mxu1 %v4632_v19  ;;  %v4678_v19 = vld [vmem:[%s5891_s1 + $0x6d0] sm:$0xff]  }
  0xa2   :  { %4231 = vmatpush3.bf16.msra.mxu0 %v4633_v22  ;;  %v4681_v22 = vld [vmem:[%s5891_s1 + $0x658] sm:$0xff]  }
  0xa3   :  { %4253 = vmatpush3.bf16.msra.mxu1 %v4634_v23  ;;  %4260 = vmatprep.subr.bf16.mxu0 %v4636_v26  ;;  %v4682_v23 = vld [vmem:[%s5891_s1 + $0x6d8] sm:$0xff]   ;;  %v4685_v26 = vld [vmem:[%s5891_s1 + $0x660] sm:$0xff]  }
  0xa4   :  { %4282 = vmatprep.subr.bf16.mxu1 %v4637_v28  ;;  %v4687_v28 = vld [vmem:[%s5891_s1 + $0x620] sm:$0xff]  }
  0xa5   :  { %3162 = vmatmul.mubr.bf16.vlgmr.msra.gmra.mrb[16].mxu0 %v270_v30  ;;  %v4689_v30 = vld [vmem:[%s5891_s1 + $0x668] sm:$0xff]  }
  0xa6   :  { %3202 = vmatmul.mubr.bf16.vlgmr.msra.gmra.mrb[16].mxu1 %v272_v31  ;;  %4261 = vmatpush3.bf16.msra.mxu0 %v4638_v29  ;;  %v4688_v29 = vld [vmem:[%s5891_s1 + $0x6a0] sm:$0xff]   ;;  %v4690_v31 = vld [vmem:[%s5891_s1 + $0x6e8] sm:$0xff]  }
  0xa7   :  { %4283 = vmatpush3.bf16.msra.mxu1 %v4639_v32  ;;  %4262 = vmatprep.subr.bf16.mxu0 %v4640_v33  ;;  %v4691_v32 = vld [vmem:[%s5891_s1 + $0x628] sm:$0xff]  }
  0xa8   :  { %4284 = vmatprep.subr.bf16.mxu1 %v4641_v35  ;;  %3241 = vmatprep.mubr.bf16.mxu0 %v275_v5  ;;  %v4692_v33 = vld [vmem:[%s5891_s1 + $0x6a8] sm:$0xff]   ;;  %v4693_v35 = vld [vmem:[%s5891_s1 + $0x670] sm:$0xff]   ;;  %v4716_v5 = vld [vmem:[%s5891_s1 + $0x718] sm:$0xff]  }
  0xa9   :  { %3281 = vmatprep.mubr.bf16.mxu1 %v277_v8  ;;  %v4719_v8 = vld [vmem:[%s5891_s1 + $0x7e0] sm:$0xff]  }
  0xaa   :  { %4263 = vmatpush3.bf16.msra.mxu0 %v4642_v36  ;;  %v4694_v36 = vld [vmem:[%s5891_s1 + $0x6f0] sm:$0xff]  }
  0xab   :  { %4285 = vmatpush3.bf16.msra.mxu1 %v4643_v37  ;;  %4264 = vmatprep.subr.bf16.mxu0 %v4644_v38  ;;  %v4695_v37 = vld [vmem:[%s5891_s1 + $0x630] sm:$0xff]  }
  0xac   :  { %4286 = vmatprep.subr.bf16.mxu1 %v4645_v39  ;;  %v4696_v38 = vld [vmem:[%s5891_s1 + $0x6b0] sm:$0xff]  }
  0xad   :  { %v30_v39 = vld [vmem:[%s5890_s0 + $0x30] sm:$0xff] }
  0xae   :  { %4265 = vmatpush3.bf16.msra.mxu0 %v4646_v40  ;;  %v4697_v40 = vld [vmem:[%s5891_s1 + $0x678] sm:$0xff]  }
  0xaf   :  { %4287 = vmatpush3.bf16.msra.mxu1 %v4647_v43  ;;  %4266 = vmatprep.subr.bf16.mxu0 %v4648_v44  ;;  %v153_v43 = vrot.slane %v30_v39, %v4968_v42  ;;  %v146_v44 = vcombine.high %v30_v39, %v30_v39 }
  0xb0   :  { %4288 = vmatprep.subr.bf16.mxu1 %v4649_v45  ;;  %v4698_v45 = vld [vmem:[%s5891_s1 + $0x6f8] sm:$0xff]  }
  0xb2   :  { %4267 = vmatpush3.bf16.msra.mxu0 %v4650_v46  ;;  %v4699_v46 = vld [vmem:[%s5891_s1 + $0x638] sm:$0xff]  }
  0xb3   :  { %4289 = vmatpush3.bf16.msra.mxu1 %v4651_v47  ;;  %4268 = vmatprep.subr.bf16.mxu0 %v4652_v48  ;;  %v161_v47 = vcombine.high %v153_v43, %v153_v43  ;;  %v160_v48 = vrot.slane %v146_v44, %v4968_v42  ;;  %v4735_v44 = vld [vmem:[%s5891_s1 + $0x840] sm:$0xff]  }
  0xb4   :  { %4290 = vmatprep.subr.bf16.mxu1 %v4653_v49  ;;  %v4700_v49 = vld [vmem:[%s5891_s1 + $0x6b8] sm:$0xff]  }
  0xb6   :  { %4269 = vmatpush3.bf16.msra.mxu0 %v4654_v50  ;;  %v279_v50 = vpack.c.bf16 %v161_v47, %v161_v47  ;;  %v4736_v47 = vld [vmem:[%s5891_s1 + $0x8c0] sm:$0xff]  }
  0xb7   :  { %4291 = vmatpush3.bf16.msra.mxu1 %v4655_v51  ;;  %4270 = vmatprep.subr.bf16.mxu0 %v4656_v52  ;;  %v162_v51 = vcombine.high %v160_v48, %v160_v48  ;;  %v4702_v52 = vld [vmem:[%s5891_s1 + $0x740] sm:$0xff]  }
  0xb8   :  { %4292 = vmatprep.subr.bf16.mxu1 %v4657_v53  ;;  %v4703_v53 = vld [vmem:[%s5891_s1 + $0x7c0] sm:$0xff]  }
  0xba   :  { %4271 = vmatpush3.bf16.msra.mxu0 %v4658_v54  ;;  %v281_v54 = vpack.c.bf16 %v162_v51, %v162_v51 }
  0xbb   :  { %4293 = vmatpush3.bf16.msra.mxu1 %v4659_v55  ;;  %4272 = vmatprep.subr.bf16.mxu0 %v4660_v56  ;;  %v4704_v55 = vld [vmem:[%s5891_s1 + $0x700] sm:$0xff]   ;;  %v278_v56 = vpack.c.bf16 %v153_v43, %v153_v43 }
  0xbc   :  { %4294 = vmatprep.subr.bf16.mxu1 %v4661_v57  ;;  %v280_v57 = vpack.c.bf16 %v160_v48, %v160_v48  ;;  %v4737_v48 = vld [vmem:[%s5891_s1 + $0x800] sm:$0xff]  }
  0xbe   :  { %4273 = vmatpush3.bf16.msra.mxu0 %v4662_v58  ;;  %v4705_v58 = vld [vmem:[%s5891_s1 + $0x780] sm:$0xff]  }
  0xbf   :  { %4295 = vmatpush3.bf16.msra.mxu1 %v4663_v60  ;;  %4274 = vmatprep.subr.bf16.mxu0 %v4664_v63  ;;  %v4707_v60 = vld [vmem:[%s5891_s1 + $0x7c8] sm:$0xff]   ;;  %v4710_v63 = vld [vmem:[%s5891_s1 + $0x750] sm:$0xff]  }
  0xc0   :  { %4296 = vmatprep.subr.bf16.mxu1 %v4665_v0  ;;  %v4711_v0 = vld [vmem:[%s5891_s1 + $0x7d0] sm:$0xff]  }
  0xc2   :  { %4275 = vmatpush3.bf16.msra.mxu0 %v4666_v3  ;;  %v4714_v3 = vld [vmem:[%s5891_s1 + $0x758] sm:$0xff]  }
  0xc3   :  { %4297 = vmatpush3.bf16.msra.mxu1 %v4667_v4  ;;  %4304 = vmatprep.subr.bf16.mxu0 %v4669_v7  ;;  %v4715_v4 = vld [vmem:[%s5891_s1 + $0x7d8] sm:$0xff]   ;;  %v4718_v7 = vld [vmem:[%s5891_s1 + $0x760] sm:$0xff]  }
  0xc4   :  { %4326 = vmatprep.subr.bf16.mxu1 %v4670_v9  ;;  %v4720_v9 = vld [vmem:[%s5891_s1 + $0x720] sm:$0xff]  }
  0xc5   :  { %3242 = vmatmul.mubr.bf16.vlgmr.msra.gmra.mrb[20].mxu0 %v274_v11  ;;  %v4722_v11 = vld [vmem:[%s5891_s1 + $0x768] sm:$0xff]  }
  0xc6   :  { %3282 = vmatmul.mubr.bf16.vlgmr.msra.gmra.mrb[20].mxu1 %v276_v12  ;;  %4305 = vmatpush3.bf16.msra.mxu0 %v4671_v10  ;;  %v4721_v10 = vld [vmem:[%s5891_s1 + $0x7a0] sm:$0xff]   ;;  %v4723_v12 = vld [vmem:[%s5891_s1 + $0x7e8] sm:$0xff]  }
  0xc7   :  { %4327 = vmatpush3.bf16.msra.mxu1 %v4672_v13  ;;  %4306 = vmatprep.subr.bf16.mxu0 %v4673_v14  ;;  %v4724_v13 = vld [vmem:[%s5891_s1 + $0x728] sm:$0xff]  }
  0xc8   :  { %4328 = vmatprep.subr.bf16.mxu1 %v4674_v15  ;;  %3321 = vmatprep.mubr.bf16.mxu0 %v279_v50  ;;  %v4725_v14 = vld [vmem:[%s5891_s1 + $0x7a8] sm:$0xff]   ;;  %v4726_v15 = vld [vmem:[%s5891_s1 + $0x770] sm:$0xff]  }
  0xc9   :  { %3361 = vmatprep.mubr.bf16.mxu1 %v281_v54  ;;  %v4740_v54 = vld [vmem:[%s5891_s1 + $0x8c8] sm:$0xff]  }
  0xca   :  { %4307 = vmatpush3.bf16.msra.mxu0 %v4675_v16  ;;  %v3723_v16 = vld [vmem:[%s5892_s2] ss:$0 sm:$0xff] }
  0xcb   :  { %4329 = vmatpush3.bf16.msra.mxu1 %v4676_v17  ;;  %4308 = vmatprep.subr.bf16.mxu0 %v4677_v18  ;;  %v4727_v17 = vld [vmem:[%s5891_s1 + $0x7f0] sm:$0xff]  }
  0xcc   :  { %4330 = vmatprep.subr.bf16.mxu1 %v4678_v19 }
  0xce   :  { %4309 = vmatpush3.bf16.msra.mxu0 %v4679_v20  ;;  %v4728_v20 = vld [vmem:[%s5891_s1 + $0x730] sm:$0xff]  }
  0xcf   :  { %4331 = vmatpush3.bf16.msra.mxu1 %v4680_v21  ;;  %4310 = vmatprep.subr.bf16.mxu0 %v4681_v22  ;;  %v4729_v21 = vld [vmem:[%s5891_s1 + $0x7b0] sm:$0xff]  }
  0xd0   :  { %4332 = vmatprep.subr.bf16.mxu1 %v4682_v23 }
  0xd2   :  { %4311 = vmatpush3.bf16.msra.mxu0 %v4683_v24  ;;  %v4730_v24 = vld [vmem:[%s5891_s1 + $0x778] sm:$0xff]  }
  0xd3   :  { %4333 = vmatpush3.bf16.msra.mxu1 %v4684_v25  ;;  %4312 = vmatprep.subr.bf16.mxu0 %v4685_v26 }
  0xd4   :  { %4334 = vmatprep.subr.bf16.mxu1 %v4686_v27 }
  0xd6   :  { %4313 = vmatpush3.bf16.msra.mxu0 %v4687_v28 }
  0xd7   :  { %4335 = vmatpush3.bf16.msra.mxu1 %v4688_v29  ;;  %4314 = vmatprep.subr.bf16.mxu0 %v4689_v30  ;;  %v4731_v29 = vld [vmem:[%s5891_s1 + $0x7f8] sm:$0xff]  }
  0xd8   :  { %4336 = vmatprep.subr.bf16.mxu1 %v4690_v31  ;;  %v31_v30 = vld [vmem:[%s5890_s0 + $0x38] sm:$0xff] }
  0xda   :  { %4315 = vmatpush3.bf16.msra.mxu0 %v4691_v32 }
  0xdb   :  { %4337 = vmatpush3.bf16.msra.mxu1 %v4692_v33  ;;  %4316 = vmatprep.subr.bf16.mxu0 %v4693_v35  ;;  %v170_v33 = vrot.slane %v31_v30, %v4968_v42  ;;  %v163_v35 = vcombine.high %v31_v30, %v31_v30 }
  0xdc   :  { %4338 = vmatprep.subr.bf16.mxu1 %v4694_v36 }
  0xdd   :  { %v178_v39 = vcombine.high %v170_v33, %v170_v33  ;;  %v282_v50 = vpack.c.bf16 %v170_v33, %v170_v33 }
  0xde   :  { %4317 = vmatpush3.bf16.msra.mxu0 %v4695_v37  ;;  %v4732_v37 = vld [vmem:[%s5891_s1 + $0x738] sm:$0xff]  }
  0xdf   :  { %4339 = vmatpush3.bf16.msra.mxu1 %v4696_v38  ;;  %4318 = vmatprep.subr.bf16.mxu0 %v4697_v40  ;;  %v4733_v38 = vld [vmem:[%s5891_s1 + $0x7b8] sm:$0xff]   ;;  %v177_v40 = vrot.slane %v163_v35, %v4968_v42  ;;  %v4768_v35 = vld [vmem:[%s5891_s1 + $0x940] sm:$0xff]  }
  0xe0   :  { %4340 = vmatprep.subr.bf16.mxu1 %v4698_v45  ;;  %v283_v45 = vpack.c.bf16 %v178_v39, %v178_v39 }
  0xe1   :  { %v284_v51 = vpack.c.bf16 %v177_v40, %v177_v40 }
  0xe2   :  { %4319 = vmatpush3.bf16.msra.mxu0 %v4699_v46  ;;  %v179_v46 = vcombine.high %v177_v40, %v177_v40  ;;  %v4769_v40 = vld [vmem:[%s5891_s1 + $0x900] sm:$0xff]  }
  0xe3   :  { %4341 = vmatpush3.bf16.msra.mxu1 %v4700_v49  ;;  %4348 = vmatprep.subr.bf16.mxu0 %v4702_v52  ;;  %v4738_v52 = vld [vmem:[%s5891_s1 + $0x880] sm:$0xff]  }
  0xe4   :  { %4370 = vmatprep.subr.bf16.mxu1 %v4703_v53  ;;  %v285_v49 = vpack.c.bf16 %v179_v46, %v179_v46  ;;  %v4739_v53 = vld [vmem:[%s5891_s1 + $0x848] sm:$0xff]  }
  0xe5   :  { %3322 = vmatmul.mubr.bf16.vlgmr.msra.gmra.mrb[24].mxu0 %v278_v56  ;;  %v4742_v56 = vld [vmem:[%s5891_s1 + $0x888] sm:$0xff]  }
  0xe6   :  { %3362 = vmatmul.mubr.bf16.vlgmr.msra.gmra.mrb[24].mxu1 %v280_v57  ;;  %4349 = vmatpush3.bf16.msra.mxu0 %v4704_v55  ;;  %v4741_v55 = vld [vmem:[%s5891_s1 + $0x808] sm:$0xff]   ;;  %v4743_v57 = vld [vmem:[%s5891_s1 + $0x850] sm:$0xff]  }
  0xe7   :  { %4371 = vmatpush3.bf16.msra.mxu1 %v4705_v58  ;;  %4350 = vmatprep.subr.bf16.mxu0 %v4706_v59  ;;  %v4744_v58 = vld [vmem:[%s5891_s1 + $0x8d0] sm:$0xff]   ;;  %v4772_v46 = vld [vmem:[%s5891_s1 + $0x908] sm:$0xff]  }
  0xe8   :  { %4372 = vmatprep.subr.bf16.mxu1 %v4707_v60  ;;  %3401 = vmatprep.mubr.bf16.mxu0 %v283_v45  ;;  %v4745_v59 = vld [vmem:[%s5891_s1 + $0x810] sm:$0xff]   ;;  %v4771_v45 = vld [vmem:[%s5891_s1 + $0x948] sm:$0xff]  }
  0xe9   :  { %3441 = vmatprep.mubr.bf16.mxu1 %v285_v49  ;;  %v4746_v60 = vld [vmem:[%s5891_s1 + $0x890] sm:$0xff]  }
  0xea   :  { %4351 = vmatpush3.bf16.msra.mxu0 %v4708_v61  ;;  %v4747_v61 = vld [vmem:[%s5891_s1 + $0x858] sm:$0xff]   ;;  %v4775_v49 = vld [vmem:[%s5891_s1 + $0x910] sm:$0xff]  }
  0xeb   :  { %4373 = vmatpush3.bf16.msra.mxu1 %v4709_v62  ;;  %4352 = vmatprep.subr.bf16.mxu0 %v4710_v63  ;;  %v4748_v62 = vld [vmem:[%s5891_s1 + $0x8d8] sm:$0xff]  }
  0xec   :  { %4374 = vmatprep.subr.bf16.mxu1 %v4711_v0  ;;  %v4749_v63 = vld [vmem:[%s5891_s1 + $0x818] sm:$0xff]  }
  0xed   :  { %v4750_v0 = vld [vmem:[%s5891_s1 + $0x898] sm:$0xff]  }
  0xee   :  { %4353 = vmatpush3.bf16.msra.mxu0 %v4712_v1  ;;  %v4751_v1 = vld [vmem:[%s5891_s1 + $0x860] sm:$0xff]  }
  0xef   :  { %4375 = vmatpush3.bf16.msra.mxu1 %v4713_v2  ;;  %4354 = vmatprep.subr.bf16.mxu0 %v4714_v3  ;;  %v4752_v2 = vld [vmem:[%s5891_s1 + $0x8e0] sm:$0xff]  }
  0xf0   :  { %4376 = vmatprep.subr.bf16.mxu1 %v4715_v4  ;;  %v4753_v3 = vld [vmem:[%s5891_s1 + $0x820] sm:$0xff]  }
  0xf1   :  { %v4754_v4 = vld [vmem:[%s5891_s1 + $0x8a0] sm:$0xff]  }
  0xf2   :  { %4355 = vmatpush3.bf16.msra.mxu0 %v4716_v5  ;;  %v4755_v5 = vld [vmem:[%s5891_s1 + $0x868] sm:$0xff]  }
  0xf3   :  { %4377 = vmatpush3.bf16.msra.mxu1 %v4717_v6  ;;  %4356 = vmatprep.subr.bf16.mxu0 %v4718_v7  ;;  %v4756_v6 = vld [vmem:[%s5891_s1 + $0x8e8] sm:$0xff]  }
  0xf4   :  { %4378 = vmatprep.subr.bf16.mxu1 %v4719_v8  ;;  %v4757_v7 = vld [vmem:[%s5891_s1 + $0x828] sm:$0xff]  }
  0xf5   :  { %v4758_v8 = vld [vmem:[%s5891_s1 + $0x8a8] sm:$0xff]  }
  0xf6   :  { %4357 = vmatpush3.bf16.msra.mxu0 %v4720_v9  ;;  %v4759_v9 = vld [vmem:[%s5891_s1 + $0x870] sm:$0xff]  }
  0xf7   :  { %4379 = vmatpush3.bf16.msra.mxu1 %v4721_v10  ;;  %4358 = vmatprep.subr.bf16.mxu0 %v4722_v11  ;;  %v4760_v10 = vld [vmem:[%s5891_s1 + $0x8f0] sm:$0xff]  }
  0xf8   :  { %4380 = vmatprep.subr.bf16.mxu1 %v4723_v12  ;;  %v4056_v18 = vpop.f32.mrb[0].mxu0 }
  0xf9   :  { %v4078_v19 = vpop.f32.mrb[0].mxu1  ;;  %v4057_v22 = vpop.f32.mrb[1].mxu0 }
  0xfa   :  { %v4079_v23 = vpop.f32.mrb[1].mxu1  ;;  %v4058_v25 = vadd.f32 %v4057_v22, %v4056_v18  ;;  %v4059_v27 = vpop.f32.mrb[2].mxu0  ;;  %4359 = vmatpush3.bf16.msra.mxu0 %v4724_v13  ;;  %v4761_v13 = vld [vmem:[%s5891_s1 + $0x830] sm:$0xff]  }
  0xfb   :  { %v4080_v26 = vadd.f32 %v4079_v23, %v4078_v19  ;;  %v4081_v28 = vpop.f32.mrb[2].mxu1  ;;  %4381 = vmatpush3.bf16.msra.mxu1 %v4725_v14  ;;  %v4060_v31 = vpop.f32.mrb[3].mxu0  ;;  %4360 = vmatprep.subr.bf16.mxu0 %v4726_v15  ;;  %v4762_v14 = vld [vmem:[%s5891_s1 + $0x8b0] sm:$0xff]  }
  0xfc   :  { %v4082_v32 = vpop.f32.mrb[3].mxu1  ;;  %4382 = vmatprep.subr.bf16.mxu1 %v4727_v17  ;;  %v2844_v36 = vadd.f32 %v4058_v25, %v3723_v16  ;;  %v4763_v17 = vld [vmem:[%s5891_s1 + $0x878] sm:$0xff]   ;;  %v32_v25 = vld [vmem:[%s5890_s0 + $0x40] sm:$0xff] }
  0xfd   :  { %v187_v27 = vrot.slane %v32_v25, %v4968_v42  ;;  %v180_v28 = vcombine.high %v32_v25, %v32_v25  ;;  %v4766_v31 = vld [vmem:[%s5891_s1 + $0x8b8] sm:$0xff]  }
  0xfe   :  { %v5677_v43 = vadd.f32 %v4080_v26, %v2844_v36  ;;  %4361 = vmatpush3.bf16.msra.mxu0 %v4728_v20 }
  0xff   :  { %4383 = vmatpush3.bf16.msra.mxu1 %v4729_v21  ;;  %4362 = vmatprep.subr.bf16.mxu0 %v4730_v24  ;;  %v4764_v24 = vld [vmem:[%s5891_s1 + $0x8f8] sm:$0xff]   ;;  %v195_v32 = vcombine.high %v187_v27, %v187_v27  ;;  %v194_v33 = vrot.slane %v180_v28, %v4968_v42 }
 0x100   :  { %4384 = vmatprep.subr.bf16.mxu1 %v4731_v29  ;;  %v4765_v29 = vld [vmem:[%s5891_s1 + $0x838] sm:$0xff]  }
 0x101   :  { %v287_v36 = vpack.c.bf16 %v195_v32, %v195_v32  ;;  %v288_v39 = vpack.c.bf16 %v194_v33, %v194_v33 }
 0x102   :  { %4363 = vmatpush3.bf16.msra.mxu0 %v4732_v37  ;;  %v196_v37 = vcombine.high %v194_v33, %v194_v33 }
 0x103   :  { %4385 = vmatpush3.bf16.msra.mxu1 %v4733_v38  ;;  %4392 = vmatprep.subr.bf16.mxu0 %v4735_v44  ;;  %v286_v38 = vpack.c.bf16 %v187_v27, %v187_v27  ;;  %v4770_v44 = vld [vmem:[%s5891_s1 + $0x980] sm:$0xff]  }
 0x104   :  { %4414 = vmatprep.subr.bf16.mxu1 %v4736_v47  ;;  %v4773_v47 = vld [vmem:[%s5891_s1 + $0x988] sm:$0xff]  }
 0x105   :  { %3402 = vmatmul.mubr.bf16.vlgmr.msra.gmra.mrb[28].mxu0 %v282_v50  ;;  %v4776_v50 = vld [vmem:[%s5891_s1 + $0x990] sm:$0xff]  }
 0x106   :  { %3442 = vmatmul.mubr.bf16.vlgmr.msra.gmra.mrb[28].mxu1 %v284_v51  ;;  %4393 = vmatpush3.bf16.msra.mxu0 %v4737_v48  ;;  %v4774_v48 = vld [vmem:[%s5891_s1 + $0x950] sm:$0xff]   ;;  %v4777_v51 = vld [vmem:[%s5891_s1 + $0x958] sm:$0xff]  }
 0x107   :  { %4415 = vmatpush3.bf16.msra.mxu1 %v4738_v52  ;;  %4394 = vmatprep.subr.bf16.mxu0 %v4739_v53  ;;  %v4778_v52 = vld [vmem:[%s5891_s1 + $0x918] sm:$0xff]  }
 0x108   :  { %4416 = vmatprep.subr.bf16.mxu1 %v4740_v54  ;;  %3481 = vmatprep.mubr.bf16.mxu0 %v287_v36  ;;  %v4779_v53 = vld [vmem:[%s5891_s1 + $0x998] sm:$0xff]   ;;  %v4780_v54 = vld [vmem:[%s5891_s1 + $0x960] sm:$0xff]  }
 0x10a   :  { %4395 = vmatpush3.bf16.msra.mxu0 %v4741_v55  ;;  %v4781_v55 = vld [vmem:[%s5891_s1 + $0x920] sm:$0xff]  }
 0x10b   :  { %4417 = vmatpush3.bf16.msra.mxu1 %v4742_v56  ;;  %4396 = vmatprep.subr.bf16.mxu0 %v4743_v57  ;;  %v4782_v56 = vld [vmem:[%s5891_s1 + $0x9a0] sm:$0xff]   ;;  %v4783_v57 = vld [vmem:[%s5891_s1 + $0x968] sm:$0xff]  }
 0x10c   :  { %4418 = vmatprep.subr.bf16.mxu1 %v4744_v58  ;;  %v33_v58 = vld [vmem:[%s5890_s0 + $0x48] sm:$0xff] }
 0x10e   :  { %4397 = vmatpush3.bf16.msra.mxu0 %v4745_v59  ;;  %v197_v59 = vcombine.high %v33_v58, %v33_v58 }
 0x10f   :  { %4419 = vmatpush3.bf16.msra.mxu1 %v4746_v60  ;;  %4398 = vmatprep.subr.bf16.mxu0 %v4747_v61  ;;  %v204_v60 = vrot.slane %v33_v58, %v4968_v42 }
 0x110   :  { %4420 = vmatprep.subr.bf16.mxu1 %v4748_v62 }
 0x112   :  { %4399 = vmatpush3.bf16.msra.mxu0 %v4749_v63 }
 0x113   :  { %4421 = vmatpush3.bf16.msra.mxu1 %v4750_v0  ;;  %4400 = vmatprep.subr.bf16.mxu0 %v4751_v1 }
 0x114   :  { %4422 = vmatprep.subr.bf16.mxu1 %v4752_v2 }
 0x116   :  { %4401 = vmatpush3.bf16.msra.mxu0 %v4753_v3 }
 0x117   :  { %4423 = vmatpush3.bf16.msra.mxu1 %v4754_v4  ;;  %4402 = vmatprep.subr.bf16.mxu0 %v4755_v5 }
 0x118   :  { %4424 = vmatprep.subr.bf16.mxu1 %v4756_v6  ;;  %v4100_v11 = vpop.f32.mrb[4].mxu0 }
 0x119   :  { %v4122_v12 = vpop.f32.mrb[4].mxu1  ;;  %v4101_v15 = vpop.f32.mrb[5].mxu0 }
 0x11a   :  { %v4123_v16 = vpop.f32.mrb[5].mxu1  ;;  %v4102_v18 = vadd.f32 %v4101_v15, %v4100_v11  ;;  %v4103_v20 = vpop.f32.mrb[6].mxu0  ;;  %4403 = vmatpush3.bf16.msra.mxu0 %v4757_v7 }
 0x11b   :  { %v4124_v19 = vadd.f32 %v4123_v16, %v4122_v12  ;;  %v4125_v21 = vpop.f32.mrb[6].mxu1  ;;  %4425 = vmatpush3.bf16.msra.mxu1 %v4758_v8  ;;  %v4104_v22 = vpop.f32.mrb[7].mxu0  ;;  %4404 = vmatprep.subr.bf16.mxu0 %v4759_v9 }
 0x11c   :  { %v4126_v23 = vpop.f32.mrb[7].mxu1  ;;  %4426 = vmatprep.subr.bf16.mxu1 %v4760_v10  ;;  %v2924_v26 = vadd.f32 %v4102_v18, %v5677_v43  ;;  %v289_v43 = vpack.c.bf16 %v196_v37, %v196_v37 }
 0x11e   :  { %v5777_v30 = vadd.f32 %v4124_v19, %v2924_v26  ;;  %4405 = vmatpush3.bf16.msra.mxu0 %v4761_v13  ;;  %3521 = vmatprep.mubr.bf16.mxu1 %v289_v43 }
 0x11f   :  { %4427 = vmatpush3.bf16.msra.mxu1 %v4762_v14  ;;  %4406 = vmatprep.subr.bf16.mxu0 %v4763_v17 }
 0x120   :  { %4428 = vmatprep.subr.bf16.mxu1 %v4764_v24 }
 0x122   :  { %4407 = vmatpush3.bf16.msra.mxu0 %v4765_v29 }
 0x123   :  { %4429 = vmatpush3.bf16.msra.mxu1 %v4766_v31  ;;  %4436 = vmatprep.subr.bf16.mxu0 %v4768_v35 }
 0x124   :  { %3569 = vmatprep.subr.bf16.mxu1 %v4823_v41 }
 0x125   :  { %3482 = vmatmul.mubr.bf16.vlgmr.msra.gmra.mrb[32].mxu0 %v286_v38 }
 0x126   :  { %3522 = vmatmul.mubr.bf16.vlgmr.msra.gmra.mrb[32].mxu1 %v288_v39  ;;  %4437 = vmatpush3.bf16.msra.mxu0 %v4769_v40 }
 0x127   :  { %3570 = vmatpush1.bf16.msra.mxu1 %v4770_v44  ;;  %4438 = vmatprep.subr.bf16.mxu0 %v4771_v45 }
 0x128   :  { %3571 = vmatprep.subr.bf16.mxu1 %v4823_v41 }
 0x12a   :  { %4439 = vmatpush3.bf16.msra.mxu0 %v4772_v46 }
 0x12b   :  { %3572 = vmatpush1.bf16.msra.mxu1 %v4773_v47  ;;  %4440 = vmatprep.subr.bf16.mxu0 %v4774_v48 }
 0x12c   :  { %3573 = vmatprep.subr.bf16.mxu1 %v4823_v41 }
 0x12e   :  { %4441 = vmatpush3.bf16.msra.mxu0 %v4775_v49 }
 0x12f   :  { %3574 = vmatpush1.bf16.msra.mxu1 %v4776_v50  ;;  %4442 = vmatprep.subr.bf16.mxu0 %v4777_v51 }
 0x130   :  { %3575 = vmatprep.subr.bf16.mxu1 %v4823_v41 }
 0x132   :  { %4443 = vmatpush3.bf16.msra.mxu0 %v4778_v52 }
 0x133   :  { %3576 = vmatpush1.bf16.msra.mxu1 %v4779_v53  ;;  %4444 = vmatprep.subr.bf16.mxu0 %v4780_v54 }
 0x134   :  { %3577 = vmatprep.subr.bf16.mxu1 %v4823_v41 }
 0x135   :  { %12 = vsyncpa [#allocation4], 0  ;;  %v4784_v61 = vld [vmem:[%s5891_s1 + $0x928] sm:$0xff]   ;;  %v212_v63 = vcombine.high %v204_v60, %v204_v60  ;;  %v211_v0 = vrot.slane %v197_v59, %v4968_v42  ;;  %v4786_v1 = vld [vmem:[%s5891_s1 + $0x970] sm:$0xff]   ;;  %vm2801_vm0 = vcmask 64512   ;;  %vm2805_vm1 = vcmask 1043456  }
 0x136   :  { %4445 = vmatpush3.bf16.msra.mxu0 %v4781_v55  ;;  %v4785_v62 = vld [vmem:[%s5891_s1 + $0x9a8] sm:$0xff]   ;;  %v4787_v42 = vld [vmem:[%s5891_s1 + $0x930] sm:$0xff]   ;;  %v4789_v16 = vld [vmem:[%s5891_s1 + $0x978] sm:$0xff]   ;;  %v290_v22 = vpack.c.bf16 %v204_v60, %v204_v60  ;;  %vm4825_vm2 = vmmov 0   ;;  %vm3620_vm3 = vcmask 261120   ;;  %s4826_s13 = smov [#allocation3]  }
 0x137   :  { %3578 = vmatpush1.bf16.msra.mxu1 %v4782_v56  ;;  %4446 = vmatprep.subr.bf16.mxu0 %v4783_v57  ;;  %v291_v4 = vpack.c.bf16 %v212_v63, %v212_v63  ;;  %v213_v5 = vcombine.high %v211_v0, %v211_v0  ;;  %v4788_v12 = vld [vmem:[%s5891_s1 + $0x9b0] sm:$0xff]   ;;  %v4790_v19 = vld [vmem:[%s5891_s1 + $0x938] sm:$0xff]   ;;  %v4793_v21 = vld [vmem:[%s5891_s1 + $0x9c0] ss:$0 sps:$4 sm:$0xff]   ;;  %v292_v24 = vpack.c.bf16 %v211_v0, %v211_v0  ;;  %v4824_v63 = vmov 0.0   ;;  %s3715_s14 = sshll.u32 %s4826_s13, 4  ;;  %s3716_s14 = int_to_ptr.vmem [resolvable:$true] %s3715_s14 }
 0x138   :  { %3579 = vmatprep.subr.bf16.mxu1 %v4823_v41  ;;  %v4144_v2 = vpop.f32.mrb[8].mxu0  ;;  %v4791_v20 = vld [vmem:[%s5891_s1 + $0x9b8] sm:$0xff]   ;;  %v2807_v23 = vsel %vm2805_vm1, %v4793_v21, 0  ;;  %v3610_v0 = vld [vmem:[#allocation2] sm:$0x1]  ;;  %vm3707_vm4 = vcmask 8192   ;;  %p4803_p1 = scmp.lt.s32.totalorder %s3716_s14, %s3716_s14 }
 0x139   :  { %v4166_v3 = vpop.f32.mrb[8].mxu1  ;;  %v4145_v6 = vpop.f32.mrb[9].mxu0  ;;  %v293_v13 = vpack.c.bf16 %v213_v5, %v213_v5  ;;  %3561 = vmatprep.mubr.bf16.mxu0 %v291_v4  ;;  %3613 = vperm.xlu0 %4470, %v3610_v0   ;;  %s4802_s15 = scalar_lea.vmem %s3716_s14, 32 }
 0x13a   :  { %v4167_v7 = vpop.f32.mrb[9].mxu1  ;;  %v4146_v8 = vadd.f32 %v4145_v6, %v4144_v2  ;;  %v4147_v10 = vpop.f32.mrb[10].mxu0  ;;  %4447 = vmatpush3.bf16.msra.mxu0 %v4784_v61 }
 0x13b   :  { %v4168_v9 = vadd.f32 %v4167_v7, %v4166_v3  ;;  %v4169_v11 = vpop.f32.mrb[10].mxu1  ;;  %3580 = vmatpush1.bf16.msra.mxu1 %v4785_v62  ;;  %v4148_v14 = vpop.f32.mrb[11].mxu0  ;;  %4448 = vmatprep.subr.bf16.mxu0 %v4786_v1 }
 0x13c   :  { %v4170_v15 = vpop.f32.mrb[11].mxu1  ;;  %3581 = vmatprep.subr.bf16.mxu1 %v4823_v41  ;;  %v3004_v17 = vadd.f32 %v4146_v8, %v5777_v30  ;;  %4037 = vmatprep.mubr.msk.bf16.mxu1 %vm2801_vm0, %v293_v13 }
 0x13e   :  { %v3044_v18 = vadd.f32 %v4168_v9, %v3004_v17  ;;  %4449 = vmatpush3.bf16.msra.mxu0 %v4787_v42 }
 0x13f   :  { %3582 = vmatpush1.bf16.msra.mxu1 %v4788_v12  ;;  %4450 = vmatprep.subr.bf16.mxu0 %v4789_v16 }
 0x140   :  { %3583 = vmatprep.subr.bf16.mxu1 %v4823_v41 }
 0x142   :  { %4451 = vmatpush3.bf16.msra.mxu0 %v4790_v19 }
 0x143   :  { %3584 = vmatpush1.bf16.msra.mxu1 %v4791_v20  ;;  %4460 = vmatprep.subr.mxu0 %v4824_v63 }
 0x144   :  { %3585 = vmatprep.subr.bf16.mxu1 %v4823_v41 }
 0x145   :  { %3562 = vmatmul.mubr.bf16.vlgmr.msra.gmra.mrb[36].mxu0 %v290_v22 }
 0x146   :  { %4462 = vmatprep.mubr.msk.f32.mxu0 %vm4825_vm2, %v4824_v63 }
 0x147   :  { %3586 = vmatpush1.bf16.msra.mxu1 %v2807_v23 }
 0x14a   :  { %3602 = vmatmul.mubr.bf16.vlgmr.msra.gmra.mrb[36].mxu1 %v292_v24 }
 0x158   :  { %v4188_v25 = vpop.f32.mrb[12].mxu0 }
 0x159   :  { %v4210_v26 = vpop.f32.mrb[12].mxu1  ;;  %v4189_v27 = vpop.f32.mrb[13].mxu0 }
 0x15a   :  { %v4211_v28 = vpop.f32.mrb[13].mxu1  ;;  %v4190_v29 = vadd.f32 %v4189_v27, %v4188_v25  ;;  %v4191_v31 = vpop.f32.mrb[14].mxu0 }
 0x15b   :  { %v4212_v30 = vadd.f32 %v4211_v28, %v4210_v26  ;;  %v4213_v32 = vpop.f32.mrb[14].mxu1  ;;  %v4192_v33 = vpop.f32.mrb[15].mxu0 }
 0x15c   :  { %v4214_v35 = vpop.f32.mrb[15].mxu1  ;;  %v3084_v36 = vadd.f32 %v4190_v29, %v3044_v18 }
 0x15e   :  { %v3124_v37 = vadd.f32 %v4212_v30, %v3084_v36 }
 0x178   :  { %v4232_v38 = vpop.f32.mrb[16].mxu0 }
 0x179   :  { %v4254_v39 = vpop.f32.mrb[16].mxu1  ;;  %v4233_v41 = vpop.f32.mrb[17].mxu0 }
 0x17a   :  { %v4255_v40 = vpop.f32.mrb[17].mxu1  ;;  %v4234_v43 = vadd.f32 %v4233_v41, %v4232_v38  ;;  %v4235_v45 = vpop.f32.mrb[18].mxu0 }
 0x17b   :  { %v4256_v44 = vadd.f32 %v4255_v40, %v4254_v39  ;;  %v4257_v46 = vpop.f32.mrb[18].mxu1  ;;  %v4236_v47 = vpop.f32.mrb[19].mxu0 }
 0x17c   :  { %v4258_v48 = vpop.f32.mrb[19].mxu1  ;;  %v3164_v49 = vadd.f32 %v4234_v43, %v3124_v37 }
 0x17e   :  { %v3204_v50 = vadd.f32 %v4256_v44, %v3164_v49  ;;  %v3609_v49 = vld [vmem:[%s5893_s3] sm:$0x1]  ;;  %s4798_s3 = scalar_lea.vmem %s3716_s14, 16 }
 0x17f   :  { %p4799_p0 = scmp.ne.s32.totalorder %s3716_s14, %s4798_s3  ;;  %p4804_p2 = scmp.lt.s32.totalorder %s4802_s15, %s4798_s3 }
 0x181   :  { %p4805_p3 = por %p4804_p2, %p4803_p1 }
 0x183   :  { %p4806_p4 = pnand %p4805_p3, %p4799_p0 }
 0x198   :  { %v4276_v51 = vpop.f32.mrb[20].mxu0 }
 0x199   :  { %v4298_v52 = vpop.f32.mrb[20].mxu1  ;;  %v4277_v53 = vpop.f32.mrb[21].mxu0 }
 0x19a   :  { %v4299_v54 = vpop.f32.mrb[21].mxu1  ;;  %v4278_v55 = vadd.f32 %v4277_v53, %v4276_v51  ;;  %v4279_v57 = vpop.f32.mrb[22].mxu0 }
 0x19b   :  { %v4300_v56 = vadd.f32 %v4299_v54, %v4298_v52  ;;  %v4301_v58 = vpop.f32.mrb[22].mxu1  ;;  %v4280_v59 = vpop.f32.mrb[23].mxu0 }
 0x19c   :  { %v4302_v60 = vpop.f32.mrb[23].mxu1  ;;  %v3244_v61 = vadd.f32 %v4278_v55, %v3204_v50  ;;  %v3618_v50 = vsub.s32 0, %v4956_v34 }
 0x19e   :  { %v3284_v62 = vadd.f32 %v4300_v56, %v3244_v61 }
 0x1b8   :  { %v4320_v1 = vpop.f32.mrb[24].mxu0  ;;  %v3614_v51 = vpop.permute.xlu0 %3613 }
 0x1b9   :  { %v4342_v2 = vpop.f32.mrb[24].mxu1  ;;  %v4321_v3 = vpop.f32.mrb[25].mxu0  ;;  %v3619_v52 = vrot.slane %v3614_v51, %v3618_v50 }
 0x1ba   :  { %v4343_v4 = vpop.f32.mrb[25].mxu1  ;;  %v4322_v5 = vadd.f32 %v4321_v3, %v4320_v1  ;;  %v4323_v7 = vpop.f32.mrb[26].mxu0 }
 0x1bb   :  { %v4344_v6 = vadd.f32 %v4343_v4, %v4342_v2  ;;  %v4345_v8 = vpop.f32.mrb[26].mxu1  ;;  %v4324_v9 = vpop.f32.mrb[27].mxu0 }
 0x1bc   :  { %v4346_v10 = vpop.f32.mrb[27].mxu1  ;;  %v3324_v11 = vadd.f32 %v4322_v5, %v3284_v62 }
 0x1be   :  { %v3364_v42 = vadd.f32 %v4344_v6, %v3324_v11 }
 0x1d8   :  { %v4364_v12 = vpop.f32.mrb[28].mxu0 }
 0x1d9   :  { %v4386_v13 = vpop.f32.mrb[28].mxu1  ;;  %v4365_v14 = vpop.f32.mrb[29].mxu0 }
 0x1da   :  { %v4387_v15 = vpop.f32.mrb[29].mxu1  ;;  %v4366_v16 = vadd.f32 %v4365_v14, %v4364_v12  ;;  %v4367_v18 = vpop.f32.mrb[30].mxu0 }
 0x1db   :  { %v4388_v17 = vadd.f32 %v4387_v15, %v4386_v13  ;;  %v4389_v19 = vpop.f32.mrb[30].mxu1  ;;  %v4368_v20 = vpop.f32.mrb[31].mxu0 }
 0x1dc   :  { %v4390_v21 = vpop.f32.mrb[31].mxu1  ;;  %v3404_v22 = vadd.f32 %v4366_v16, %v3364_v42 }
 0x1de   :  { %v3444_v23 = vadd.f32 %v4388_v17, %v3404_v22 }
 0x1f8   :  { %v4408_v24 = vpop.f32.mrb[32].mxu0 }
 0x1f9   :  { %v4430_v25 = vpop.f32.mrb[32].mxu1  ;;  %v4409_v26 = vpop.f32.mrb[33].mxu0 }
 0x1fa   :  { %v4431_v27 = vpop.f32.mrb[33].mxu1  ;;  %v4410_v28 = vadd.f32 %v4409_v26, %v4408_v24  ;;  %v4411_v30 = vpop.f32.mrb[34].mxu0 }
 0x1fb   :  { %v4432_v29 = vadd.f32 %v4431_v27, %v4430_v25  ;;  %v4433_v31 = vpop.f32.mrb[34].mxu1  ;;  %v4412_v32 = vpop.f32.mrb[35].mxu0 }
 0x1fc   :  { %v4434_v33 = vpop.f32.mrb[35].mxu1  ;;  %v3484_v35 = vadd.f32 %v4410_v28, %v3444_v23 }
 0x1fe   :  { %v3524_v36 = vadd.f32 %v4432_v29, %v3484_v35 }
 0x218   :  { %v4452_v37 = vpop.f32.mrb[36].mxu0 }
 0x219   :  { %v4453_v38 = vpop.f32.mrb[37].mxu0 }
 0x21a   :  { %v4454_v39 = vadd.f32 %v4453_v38, %v4452_v37  ;;  %v4455_v41 = vpop.f32.mrb[38].mxu0 }
 0x21b   :  { %v4456_v40 = vpop.f32.mrb[39].mxu0 }
 0x21c   :  { %v3564_v43 = vadd.f32 %v4454_v39, %v3524_v36 }
 0x21d   :  { %v3603_v44 = vpop.f32.mrb[36].mxu1 }
 0x21e   :  { %v3605_v45 = vpop.f32.mrb[37].mxu1  ;;  %v3604_v46 = vadd.f32 %v3603_v44, %v3564_v43 }
 0x21f   :  { %v3606_v47 = vpop.f32.mrb[38].mxu1 }
 0x220   :  { %v3607_v48 = vpop.f32.mrb[39].mxu1  ;;  %4461 = vmatpush3.xpose.msk.msra.mxu0 %vm3620_vm3, %v3604_v46 }
 0x223   :  { %4463 = vmatmul.mubr.msk.f32.vlgmr.msra.gmra.mrb[40].mxu0 %vm3620_vm3, %v3609_v49 }
 0x2f6   :  { %v3693_v53 = vpop.f32.mrb[40].mxu0 }
 0x2f7   :  { %v3694_v54 = vadd.f32 %v3693_v53, %v3619_v52  ;;  %v4464_v55 = vpop.f32.mrb[41].mxu0 }
 0x2f9   :  { %v3697_v56 = vand.u32 2147483647, %v3694_v54  ;;  %vm3701_vm5 = vcmp.ge.f32.partialorder %v3694_v54, 0.0 }
 0x2fb   :  { %v3698_v57 = vsub.f32 0.0, %v3697_v56 }
 0x2fd   :  { %v3699_v58 = vmul.f32 1.442695, %v3698_v57 }
 0x2ff   :  { %4794 = vpow2.f32 %v3699_v58 }
 0x309   :  { %v4795_v59 = vpop.eup %4794 }
 0x30a   :  { %v3702_v60 = vadd.f32 1.0, %v4795_v59 }
 0x30c   :  { %4796 = vrcp.f32 %v3702_v60 }
 0x316   :  { %v4797_v61 = vpop.eup %4796 }
 0x317   :  { %v3705_v62 = vmul.f32 %v4797_v61, %v4795_v59 }
 0x319   :  { %v3706_v34 = vsel %vm3701_vm5, %v4797_v61, %v3705_v62 }
 0x31a   :  { %3708 = vst.msk [vmem:[#allocation3] sm:$0x1] %vm3707_vm4, %v3706_v34 }
 0x31b   :  { %4809 = shalt.err (!%p4806_p4)
}
 0x31c   :  { %s4810_s18 = scalar_lea.hbm %s5895_s5, 16 }
 0x31d   :  { %p4811_p5 = scmp.ne.s32.totalorder %s5895_s5, %s4810_s18  ;;  %p4814_p6 = scmp.lt.u32.totalorder %s4810_s18, %s5895_s5 }
 0x31f   :  { %p4816_p7 = pnand %p4814_p6, %p4811_p5 }
 0x321   :  { %4819 = shalt.err (!%p4816_p7)
}
 0x322   :  { %3718 = dma.vmem_to_hbm [thread:$0]  %s3716_s14, 16, %s5895_s5, [#allocation4]  }
 0x323   :  { %4820 = dma.done.wait [#allocation4], 16  }
 0x324   :  { %4821 = vsyncadd [#allocation4], 4294967280 }
 0x325   :  { %3722 = vsyncpa [#allocation4], 1 }

</bundles_post_ra>
